<compile_context>
chip_gen: v7x
topology: tpu7x:2x2x1
jax: 0.10.0
libtpu: 0.0.40
codegen_flags: <defaults>
</compile_context>

<pallas_src>
import math

import jax
import jax.numpy as jnp
from jax.experimental import pallas as pl
from jax.experimental.pallas import tpu as pltpu

LANE = 128


def _pad_up(n, m=LANE):
    return ((n + m - 1) // m) * m


# ----------------------------------------------------------------------------
# Fused Pallas kernel
# ----------------------------------------------------------------------------
def _make_vae_kernel(n_hidden):
    """Build the fused VAE forward kernel for len(hidden_dims) == n_hidden.

    Ref order (all whole-array VMEM refs):
      inputs : x,
               n_hidden * (w, b)          # encoder hidden layers (ReLU)
               w_mu, b_mu, w_lv, b_lv,    # encoder head (split along out dim)
               eps,                       # reparameterization noise
               n_hidden * (w, b)          # decoder hidden layers (ReLU)
               w_out, b_out               # decoder head (Sigmoid)
      outputs: recon, mu, logvar
    """

    def kernel(*refs):
        it = iter(refs)
        x_ref = next(it)
        enc_hidden = [(next(it), next(it)) for _ in range(n_hidden)]
        w_mu, b_mu = next(it), next(it)
        w_lv, b_lv = next(it), next(it)
        eps_ref = next(it)
        dec_hidden = [(next(it), next(it)) for _ in range(n_hidden)]
        w_out, b_out = next(it), next(it)
        recon_ref, mu_ref, logvar_ref = next(it), next(it), next(it)

        def matmul(h, w_ref):
            # bf16 x bf16 on the MXU, f32 accumulation.
            return jnp.dot(h.astype(jnp.bfloat16), w_ref[...],
                           preferred_element_type=jnp.float32)

        # ---- encoder ------------------------------------------------------
        h = x_ref[...]
        for w_ref, b_ref in enc_hidden:
            h = jnp.maximum(matmul(h, w_ref) + b_ref[...], 0.0)

        mu = matmul(h, w_mu) + b_mu[...]
        logvar = matmul(h, w_lv) + b_lv[...]

        # ---- reparameterize: z = mu + eps * exp(0.5 * logvar) (f32, EUP) ---
        z = mu + eps_ref[...] * jnp.exp(0.5 * logvar)

        # ---- decoder ------------------------------------------------------
        h = z
        for w_ref, b_ref in dec_hidden:
            h = jnp.maximum(matmul(h, w_ref) + b_ref[...], 0.0)
        y = matmul(h, w_out) + b_out[...]

        recon_ref[...] = jax.nn.sigmoid(y).astype(recon_ref.dtype)
        mu_ref[...] = mu.astype(mu_ref.dtype)
        logvar_ref[...] = logvar.astype(logvar_ref.dtype)

    return kernel


# ----------------------------------------------------------------------------
# VAE model (parameters built deterministically in-script)
# ----------------------------------------------------------------------------
class VAEPallas:
    def __init__(self, config, channels, height, width, key):
        self.config = config
        self.hidden_dims = list(config["hidden_dims"])
        self.latent_dim = int(config["latent_dim"])
        self.channels, self.height, self.width = channels, height, width
        self.input_dim = channels * height * width
        self.input_pad = _pad_up(self.input_dim)
        self.latent_pad = _pad_up(self.latent_dim)
        self._mm_dims = []  # padded (in, out) of every matmul, for CostEstimate

        def init_linear(key, in_dim, out_dim):
            kw, kb = jax.random.split(key)
            bound = 1.0 / math.sqrt(in_dim)
            w = jax.random.uniform(kw, (out_dim, in_dim), jnp.float32, -bound, bound)
            b = jax.random.uniform(kb, (out_dim,), jnp.float32, -bound, bound)
            return w, b

        def pack(w, b, in_pad, out_pad):
            """[out,in] torch layout -> ([in_pad,out_pad] bf16, [1,out_pad] f32),
            transposed + zero-padded once at init (zero padding keeps the padded
            lanes inert through relu/sigmoid)."""
            out_dim, in_dim = w.shape
            w_t = jnp.transpose(w)  # [in, out]
            w_p = jnp.pad(w_t, ((0, in_pad - in_dim), (0, out_pad - out_dim)))
            b_p = jnp.pad(b, (0, out_pad - out_dim)).reshape(1, out_pad)
            self._mm_dims.append((in_pad, out_pad))
            return w_p.astype(jnp.bfloat16), b_p.astype(jnp.float32)

        # ---- encoder hidden layers (Linear + ReLU) ----
        self.enc_hidden = []
        in_dim, in_pad = self.input_dim, self.input_pad
        for h in self.hidden_dims:
            key, sub = jax.random.split(key)
            w, b = init_linear(sub, in_dim, h)
            self.enc_hidden.append(pack(w, b, in_pad, _pad_up(h)))
            in_dim, in_pad = h, _pad_up(h)

        # ---- encoder head: one Linear(in, 2*latent), split into mu / logvar ----
        key, sub = jax.random.split(key)
        w, b = init_linear(sub, in_dim, 2 * self.latent_dim)
        L = self.latent_dim
        self.w_mu, self.b_mu = pack(w[:L], b[:L], in_pad, self.latent_pad)
        self.w_lv, self.b_lv = pack(w[L:], b[L:], in_pad, self.latent_pad)

        # ---- decoder hidden layers (Linear + ReLU) ----
        self.dec_hidden = []
        in_dim, in_pad = self.latent_dim, self.latent_pad
        for h in reversed(self.hidden_dims):
            key, sub = jax.random.split(key)
            w, b = init_linear(sub, in_dim, h)
            self.dec_hidden.append(pack(w, b, in_pad, _pad_up(h)))
            in_dim, in_pad = h, _pad_up(h)

        # ---- decoder head: Linear(in, input_dim) + Sigmoid ----
        key, sub = jax.random.split(key)
        w, b = init_linear(sub, in_dim, self.input_dim)
        self.w_out, self.b_out = pack(w, b, in_pad, self.input_pad)

    def forward(self, x, eps_key):
        B = x.shape[0]
        x_flat = x.reshape(B, self.input_dim).astype(jnp.float32)
        if self.input_pad != self.input_dim:
            x_flat = jnp.pad(x_flat, ((0, 0), (0, self.input_pad - self.input_dim)))

        # TODO(synk): eps could be drawn in-kernel via pltpu.prng_seed +
        # pltpu.prng_random_bits to drop this input; kept external to preserve
        # jax.random gaussian semantics.
        eps = jax.random.normal(eps_key, (B, self.latent_pad), dtype=jnp.float32)

        inputs = [x_flat]
        for w, b in self.enc_hidden:
            inputs += [w, b]
        inputs += [self.w_mu, self.b_mu, self.w_lv, self.b_lv, eps]
        for w, b in self.dec_hidden:
            inputs += [w, b]
        inputs += [self.w_out, self.b_out]

        out_shape = (
            jax.ShapeDtypeStruct((B, self.input_pad), jnp.float32),
            jax.ShapeDtypeStruct((B, self.latent_pad), jnp.float32),
            jax.ShapeDtypeStruct((B, self.latent_pad), jnp.float32),
        )
        vmem = pl.BlockSpec(memory_space=pltpu.MemorySpace.VMEM)

        in_bytes = sum(int(a.size) * a.dtype.itemsize for a in inputs)
        out_bytes = sum(int(math.prod(s.shape)) * 4 for s in out_shape)
        flops = int(sum(2 * B * i * o for i, o in self._mm_dims))
        cost = pl.CostEstimate(
            flops=flops,
            transcendentals=int(B * (self.latent_pad + self.input_pad)),
            bytes_accessed=int(in_bytes + out_bytes),
        )

        recon_p, mu_p, logvar_p = pl.pallas_call(
            _make_vae_kernel(len(self.hidden_dims)),
            out_shape=out_shape,
            in_specs=[vmem] * len(inputs),
            out_specs=(vmem, vmem, vmem),
            cost_estimate=cost,
        )(*inputs)

        recon = recon_p[:, : self.input_dim].reshape(
            B, self.channels, self.height, self.width)
        mu = mu_p[:, : self.latent_dim]
        logvar = logvar_p[:, : self.latent_dim]
        return recon, mu, logvar


# ----------------------------------------------------------------------------
# Main
# ----------------------------------------------------------------------------
if __name__ == "__main__":
    key = jax.random.PRNGKey(0)
    k_param, k_input, k_eps = jax.random.split(key, 3)

    # Small, forward-consistent shapes.
    B, C, H, W = 2, 4, 16, 16
    config = {"hidden_dims": [64, 32], "latent_dim": 8}

    model = VAEPallas(config, channels=C, height=H, width=W, key=k_param)

    x = jax.random.uniform(k_input, (B, C, H, W), dtype=jnp.float32)  # NCHW

    recon, mu, logvar = model.forward(x, k_eps)
    jax.block_until_ready((recon, mu, logvar))

    assert recon.shape == (B, C, H, W)
    assert mu.shape == (B, config["latent_dim"])
    assert logvar.shape == (B, config["latent_dim"])
    assert bool(jnp.all((recon >= 0.0) & (recon <= 1.0)))
    assert bool(jnp.all(jnp.isfinite(mu))) and bool(jnp.all(jnp.isfinite(logvar)))

    print("KERNEL_OK")
</pallas_src>

<mosaic_0001>
module attributes {stable_mosaic.version = 11 : i64} {
  func.func @kernel(%arg0: memref<2x1024xf32, #tpu.memory_space<vmem>>, %arg1: memref<1024x128xbf16, #tpu.memory_space<vmem>>, %arg2: memref<1x128xf32, #tpu.memory_space<vmem>>, %arg3: memref<128x128xbf16, #tpu.memory_space<vmem>>, %arg4: memref<1x128xf32, #tpu.memory_space<vmem>>, %arg5: memref<128x128xbf16, #tpu.memory_space<vmem>>, %arg6: memref<1x128xf32, #tpu.memory_space<vmem>>, %arg7: memref<128x128xbf16, #tpu.memory_space<vmem>>, %arg8: memref<1x128xf32, #tpu.memory_space<vmem>>, %arg9: memref<2x128xf32, #tpu.memory_space<vmem>>, %arg10: memref<128x128xbf16, #tpu.memory_space<vmem>>, %arg11: memref<1x128xf32, #tpu.memory_space<vmem>>, %arg12: memref<128x128xbf16, #tpu.memory_space<vmem>>, %arg13: memref<1x128xf32, #tpu.memory_space<vmem>>, %arg14: memref<128x1024xbf16, #tpu.memory_space<vmem>>, %arg15: memref<1x1024xf32, #tpu.memory_space<vmem>>, %arg16: memref<2x1024xf32, #tpu.memory_space<vmem>>, %arg17: memref<2x128xf32, #tpu.memory_space<vmem>>, %arg18: memref<2x128xf32, #tpu.memory_space<vmem>>) attributes {dimension_semantics = [], scalar_prefetch = 0 : i64, scratch_operands = 0 : i64, tpu.core_type = #tpu.core_type<tc>} {
    %c0 = arith.constant 0 : index
    %c0_0 = arith.constant 0 : index
    %0 = vector.load %arg0[%c0, %c0_0] : memref<2x1024xf32, #tpu.memory_space<vmem>>, vector<2x1024xf32>
    %1 = arith.truncf %0 : vector<2x1024xf32> to vector<2x1024xbf16>
    %c0_1 = arith.constant 0 : index
    %c0_2 = arith.constant 0 : index
    %2 = vector.load %arg1[%c0_1, %c0_2] : memref<1024x128xbf16, #tpu.memory_space<vmem>>, vector<1024x128xbf16>
    %cst = arith.constant dense<0.000000e+00> : vector<2x128xf32>
    %3 = tpu.matmul %1, %2, %cst {dimension_numbers = #tpu.dot_dimension_numbers<[1], [0], [0], [1], [0, 0, 1, 1], [], []>} : vector<2x1024xbf16>, vector<1024x128xbf16>, vector<2x128xf32> -> vector<2x128xf32>
    %c0_3 = arith.constant 0 : index
    %c0_4 = arith.constant 0 : index
    %4 = vector.load %arg2[%c0_3, %c0_4] : memref<1x128xf32, #tpu.memory_space<vmem>>, vector<1x128xf32>
    %5 = vector.broadcast %4 : vector<1x128xf32> to vector<2x128xf32>
    %6 = arith.addf %3, %5 : vector<2x128xf32>
    %cst_5 = arith.constant 0.000000e+00 : f32
    %7 = vector.broadcast %cst_5 : f32 to vector<2x128xf32>
    %8 = arith.maximumf %6, %7 : vector<2x128xf32>
    %9 = arith.truncf %8 : vector<2x128xf32> to vector<2x128xbf16>
    %c0_6 = arith.constant 0 : index
    %c0_7 = arith.constant 0 : index
    %10 = vector.load %arg3[%c0_6, %c0_7] : memref<128x128xbf16, #tpu.memory_space<vmem>>, vector<128x128xbf16>
    %cst_8 = arith.constant dense<0.000000e+00> : vector<2x128xf32>
    %11 = tpu.matmul %9, %10, %cst_8 {dimension_numbers = #tpu.dot_dimension_numbers<[1], [0], [0], [1], [0, 0, 1, 1], [], []>} : vector<2x128xbf16>, vector<128x128xbf16>, vector<2x128xf32> -> vector<2x128xf32>
    %c0_9 = arith.constant 0 : index
    %c0_10 = arith.constant 0 : index
    %12 = vector.load %arg4[%c0_9, %c0_10] : memref<1x128xf32, #tpu.memory_space<vmem>>, vector<1x128xf32>
    %13 = vector.broadcast %12 : vector<1x128xf32> to vector<2x128xf32>
    %14 = arith.addf %11, %13 : vector<2x128xf32>
    %cst_11 = arith.constant 0.000000e+00 : f32
    %15 = vector.broadcast %cst_11 : f32 to vector<2x128xf32>
    %16 = arith.maximumf %14, %15 : vector<2x128xf32>
    %17 = arith.truncf %16 : vector<2x128xf32> to vector<2x128xbf16>
    %c0_12 = arith.constant 0 : index
    %c0_13 = arith.constant 0 : index
    %18 = vector.load %arg5[%c0_12, %c0_13] : memref<128x128xbf16, #tpu.memory_space<vmem>>, vector<128x128xbf16>
    %cst_14 = arith.constant dense<0.000000e+00> : vector<2x128xf32>
    %19 = tpu.matmul %17, %18, %cst_14 {dimension_numbers = #tpu.dot_dimension_numbers<[1], [0], [0], [1], [0, 0, 1, 1], [], []>} : vector<2x128xbf16>, vector<128x128xbf16>, vector<2x128xf32> -> vector<2x128xf32>
    %c0_15 = arith.constant 0 : index
    %c0_16 = arith.constant 0 : index
    %20 = vector.load %arg6[%c0_15, %c0_16] : memref<1x128xf32, #tpu.memory_space<vmem>>, vector<1x128xf32>
    %21 = vector.broadcast %20 : vector<1x128xf32> to vector<2x128xf32>
    %22 = arith.addf %19, %21 : vector<2x128xf32>
    %23 = arith.truncf %16 : vector<2x128xf32> to vector<2x128xbf16>
    %c0_17 = arith.constant 0 : index
    %c0_18 = arith.constant 0 : index
    %24 = vector.load %arg7[%c0_17, %c0_18] : memref<128x128xbf16, #tpu.memory_space<vmem>>, vector<128x128xbf16>
    %cst_19 = arith.constant dense<0.000000e+00> : vector<2x128xf32>
    %25 = tpu.matmul %23, %24, %cst_19 {dimension_numbers = #tpu.dot_dimension_numbers<[1], [0], [0], [1], [0, 0, 1, 1], [], []>} : vector<2x128xbf16>, vector<128x128xbf16>, vector<2x128xf32> -> vector<2x128xf32>
    %c0_20 = arith.constant 0 : index
    %c0_21 = arith.constant 0 : index
    %26 = vector.load %arg8[%c0_20, %c0_21] : memref<1x128xf32, #tpu.memory_space<vmem>>, vector<1x128xf32>
    %27 = vector.broadcast %26 : vector<1x128xf32> to vector<2x128xf32>
    %28 = arith.addf %25, %27 : vector<2x128xf32>
    %c0_22 = arith.constant 0 : index
    %c0_23 = arith.constant 0 : index
    %29 = vector.load %arg9[%c0_22, %c0_23] : memref<2x128xf32, #tpu.memory_space<vmem>>, vector<2x128xf32>
    %cst_24 = arith.constant 5.000000e-01 : f32
    %30 = vector.broadcast %cst_24 : f32 to vector<2x128xf32>
    %31 = arith.mulf %30, %28 : vector<2x128xf32>
    %32 = math.exp %31 : vector<2x128xf32>
    %33 = arith.mulf %29, %32 : vector<2x128xf32>
    %34 = arith.addf %22, %33 : vector<2x128xf32>
    %35 = arith.truncf %34 : vector<2x128xf32> to vector<2x128xbf16>
    %c0_25 = arith.constant 0 : index
    %c0_26 = arith.constant 0 : index
    %36 = vector.load %arg10[%c0_25, %c0_26] : memref<128x128xbf16, #tpu.memory_space<vmem>>, vector<128x128xbf16>
    %cst_27 = arith.constant dense<0.000000e+00> : vector<2x128xf32>
    %37 = tpu.matmul %35, %36, %cst_27 {dimension_numbers = #tpu.dot_dimension_numbers<[1], [0], [0], [1], [0, 0, 1, 1], [], []>} : vector<2x128xbf16>, vector<128x128xbf16>, vector<2x128xf32> -> vector<2x128xf32>
    %c0_28 = arith.constant 0 : index
    %c0_29 = arith.constant 0 : index
    %38 = vector.load %arg11[%c0_28, %c0_29] : memref<1x128xf32, #tpu.memory_space<vmem>>, vector<1x128xf32>
    %39 = vector.broadcast %38 : vector<1x128xf32> to vector<2x128xf32>
    %40 = arith.addf %37, %39 : vector<2x128xf32>
    %cst_30 = arith.constant 0.000000e+00 : f32
    %41 = vector.broadcast %cst_30 : f32 to vector<2x128xf32>
    %42 = arith.maximumf %40, %41 : vector<2x128xf32>
    %43 = arith.truncf %42 : vector<2x128xf32> to vector<2x128xbf16>
    %c0_31 = arith.constant 0 : index
    %c0_32 = arith.constant 0 : index
    %44 = vector.load %arg12[%c0_31, %c0_32] : memref<128x128xbf16, #tpu.memory_space<vmem>>, vector<128x128xbf16>
    %cst_33 = arith.constant dense<0.000000e+00> : vector<2x128xf32>
    %45 = tpu.matmul %43, %44, %cst_33 {dimension_numbers = #tpu.dot_dimension_numbers<[1], [0], [0], [1], [0, 0, 1, 1], [], []>} : vector<2x128xbf16>, vector<128x128xbf16>, vector<2x128xf32> -> vector<2x128xf32>
    %c0_34 = arith.constant 0 : index
    %c0_35 = arith.constant 0 : index
    %46 = vector.load %arg13[%c0_34, %c0_35] : memref<1x128xf32, #tpu.memory_space<vmem>>, vector<1x128xf32>
    %47 = vector.broadcast %46 : vector<1x128xf32> to vector<2x128xf32>
    %48 = arith.addf %45, %47 : vector<2x128xf32>
    %cst_36 = arith.constant 0.000000e+00 : f32
    %49 = vector.broadcast %cst_36 : f32 to vector<2x128xf32>
    %50 = arith.maximumf %48, %49 : vector<2x128xf32>
    %51 = arith.truncf %50 : vector<2x128xf32> to vector<2x128xbf16>
    %c0_37 = arith.constant 0 : index
    %c0_38 = arith.constant 0 : index
    %52 = vector.load %arg14[%c0_37, %c0_38] : memref<128x1024xbf16, #tpu.memory_space<vmem>>, vector<128x1024xbf16>
    %cst_39 = arith.constant dense<0.000000e+00> : vector<2x1024xf32>
    %53 = tpu.matmul %51, %52, %cst_39 {dimension_numbers = #tpu.dot_dimension_numbers<[1], [0], [0], [1], [0, 0, 1, 1], [], []>} : vector<2x128xbf16>, vector<128x1024xbf16>, vector<2x1024xf32> -> vector<2x1024xf32>
    %c0_40 = arith.constant 0 : index
    %c0_41 = arith.constant 0 : index
    %54 = vector.load %arg15[%c0_40, %c0_41] : memref<1x1024xf32, #tpu.memory_space<vmem>>, vector<1x1024xf32>
    %55 = vector.broadcast %54 : vector<1x1024xf32> to vector<2x1024xf32>
    %56 = arith.addf %53, %55 : vector<2x1024xf32>
    %57 = arith.negf %56 : vector<2x1024xf32>
    %58 = math.exp %57 : vector<2x1024xf32>
    %cst_42 = arith.constant 1.000000e+00 : f32
    %59 = vector.broadcast %cst_42 : f32 to vector<2x1024xf32>
    %60 = arith.addf %59, %58 : vector<2x1024xf32>
    %61 = arith.divf %59, %60 : vector<2x1024xf32>
    %c0_43 = arith.constant 0 : index
    %c0_44 = arith.constant 0 : index
    %62 = vector.load %arg16[%c0_43, %c0_44] : memref<2x1024xf32, #tpu.memory_space<vmem>>, vector<2x1024xf32>
    tpu.vector_store %arg16[%c0_43, %c0_44], %61 {strides = array<i32>} : memref<2x1024xf32, #tpu.memory_space<vmem>>, vector<2x1024xf32>,
    %c0_45 = arith.constant 0 : index
    %c0_46 = arith.constant 0 : index
    %63 = vector.load %arg17[%c0_45, %c0_46] : memref<2x128xf32, #tpu.memory_space<vmem>>, vector<2x128xf32>
    tpu.vector_store %arg17[%c0_45, %c0_46], %22 {strides = array<i32>} : memref<2x128xf32, #tpu.memory_space<vmem>>, vector<2x128xf32>,
    %c0_47 = arith.constant 0 : index
    %c0_48 = arith.constant 0 : index
    %64 = vector.load %arg18[%c0_47, %c0_48] : memref<2x128xf32, #tpu.memory_space<vmem>>, vector<2x128xf32>
    tpu.vector_store %arg18[%c0_47, %c0_48], %28 {strides = array<i32>} : memref<2x128xf32, #tpu.memory_space<vmem>>, vector<2x128xf32>,
    return
  }
}

</mosaic_0001>

<bundles_post_ra>
// kernel: tpu_custom_call.1
= control target key start
LH: loop header
LB: loop body
LE: loop exit
PB: predicated region body
PF: predicated region fallthrough
CT: control target
= control target key end

     0   :  { %s3396_s0 = inlined_call_operand.hbm [shape: f32[2,1024], index: 0, kind: input, shape index: {}]   ;;  %s3397_s1 = inlined_call_operand.hbm [shape: bf16[1024,128], index: 1, kind: input, shape index: {}]   ;;  %s3398_s2 = inlined_call_operand.vmem [shape: f32[1,128], index: 2, kind: input, shape index: {}]   ;;  %s3399_s3 = inlined_call_operand.hbm [shape: bf16[128,128], index: 3, kind: input, shape index: {}]   ;;  %s3400_s4 = inlined_call_operand.vmem [shape: f32[1,128], index: 4, kind: input, shape index: {}]   ;;  %s3401_s5 = inlined_call_operand.hbm [shape: bf16[128,128], index: 5, kind: input, shape index: {}]   ;;  %s3402_s6 = inlined_call_operand.vmem [shape: f32[1,128], index: 6, kind: input, shape index: {}]   ;;  %s3403_s7 = inlined_call_operand.hbm [shape: bf16[128,128], index: 7, kind: input, shape index: {}]   ;;  %s3404_s8 = inlined_call_operand.vmem [shape: f32[1,128], index: 8, kind: input, shape index: {}]   ;;  %s3405_s9 = inlined_call_operand.vmem [shape: f32[2,128], index: 9, kind: input, shape index: {}]   ;;  %s3406_s10 = inlined_call_operand.hbm [shape: bf16[128,128], index: 10, kind: input, shape index: {}]   ;;  %s3407_s11 = inlined_call_operand.vmem [shape: f32[1,128], index: 11, kind: input, shape index: {}]   ;;  %s3408_s12 = inlined_call_operand.hbm [shape: bf16[128,128], index: 12, kind: input, shape index: {}]   ;;  %s3409_s13 = inlined_call_operand.vmem [shape: f32[1,128], index: 13, kind: input, shape index: {}]   ;;  %s3410_s14 = inlined_call_operand.hbm [shape: bf16[128,1024], index: 14, kind: input, shape index: {}]   ;;  %s3411_s15 = inlined_call_operand.vmem [shape: f32[1,1024], index: 15, kind: input, shape index: {}]   ;;  %s3412_s16 = inlined_call_operand.hbm [shape: f32[2,1024], index: 16, kind: output, shape index: {0}]   ;;  %s3413_s17 = inlined_call_operand.hbm [shape: f32[2,128], index: 17, kind: output, shape index: {1}]   ;;  %s3414_s18 = inlined_call_operand.hbm [shape: f32[2,128], index: 18, kind: output, shape index: {2}]  }
   0x1   :  { %3418 = sst [smem:[#allocation27_spill]] %s3396_s0 }
   0x2   :  { %3419 = sst [smem:[#allocation28_spill]] %s3397_s1 }
   0x3   :  { %3420 = sst [smem:[#allocation29_spill]] %s3398_s2 }
   0x4   :  { %3421 = sst [smem:[#allocation30_spill]] %s3411_s15 }
   0x5   :  { %3422 = sst [smem:[#allocation31_spill]] %s3412_s16 }
   0x6   :  { %24 = vsyncpa [#allocation3], 0 }
   0x7   :  { %25 = vsyncpa [#allocation6], 0 }
   0x8   :  { %26 = vsyncpa [#allocation9], 0 }
   0x9   :  { %27 = vsyncpa [#allocation12], 0 }
   0xa   :  { %28 = vsyncpa [#allocation15], 0 }
   0xb   :  { %29 = vsyncpa [#allocation4], 0 }
   0xc   :  { %30 = vsyncpa [#allocation18], 0  ;;  %s3031_s27 = smov [#allocation5]   ;;  %s3423_s0 = sld [smem:[#allocation28_spill]] }
   0xd   :  { %s46_s28 = sshll.u32 %s3031_s27, 4  ;;  %s47_s28 = int_to_ptr.vmem [resolvable:$true] %s46_s28 }
  0x12   :  { %s2775_s19 = scalar_lea.hbm %s3423_s0, 8192 }
  0x13   :  { %p2776_p0 = scmp.ne.s32.totalorder %s3423_s0, %s2775_s19  ;;  %p2779_p1 = scmp.lt.u32.totalorder %s2775_s19, %s3423_s0 }
  0x15   :  { %p2781_p2 = pnand %p2779_p1, %p2776_p0 }
  0x17   :  { %2784 = shalt.err (!%p2781_p2)
}
  0x18   :  { %s2785_s2 = scalar_lea.vmem %s47_s28, 8192  ;;  %p2790_p4 = scmp.lt.s32.totalorder %s47_s28, %s47_s28 }
  0x19   :  { %p2786_p3 = scmp.ne.s32.totalorder %s47_s28, %s2785_s2  ;;  %p2791_p5 = scmp.lt.s32.totalorder %s2785_s2, %s2785_s2 }
  0x1b   :  { %p2792_p6 = por %p2791_p5, %p2790_p4 }
  0x1d   :  { %p2793_p7 = pnand %p2792_p6, %p2786_p3 }
  0x1f   :  { %2796 = shalt.err (!%p2793_p7)
}
  0x20   :  { %s3032_s23 = smov 64   ;;  %s3033_s24 = smov 4  }
  0x21   :  { %52 = dma.hbm_to_vmem [thread:$0]  %s3423_s0, 8192, %s47_s28, [#allocation6], %s3032_s23, %s3032_s23, %s3033_s24  }
  0x22   :  { %s3034_s27 = smov [#allocation8]   ;;  %s3035_s30 = smov [#allocation11]  }
  0x23   :  { %s74_s29 = sshll.u32 %s3034_s27, 4  ;;  %s104_s19 = sshll.u32 %s3035_s30, 4  ;;  %s75_s29 = int_to_ptr.vmem [resolvable:$true] %s74_s29  ;;  %s105_s19 = int_to_ptr.vmem [resolvable:$true] %s104_s19 }
  0x24   :  { %s2797_s21 = scalar_lea.hbm %s3401_s5, 1024 }
  0x25   :  { %p2798_p8 = scmp.ne.s32.totalorder %s3401_s5, %s2797_s21  ;;  %p2801_p9 = scmp.lt.u32.totalorder %s2797_s21, %s3401_s5 }
  0x27   :  { %p2803_p10 = pnand %p2801_p9, %p2798_p8 }
  0x29   :  { %2806 = shalt.err (!%p2803_p10)
}
  0x2a   :  { %s2807_s28 = scalar_lea.vmem %s75_s29, 1024  ;;  %p2812_p12 = scmp.lt.s32.totalorder %s75_s29, %s75_s29 }
  0x2b   :  { %p2808_p11 = scmp.ne.s32.totalorder %s75_s29, %s2807_s28  ;;  %p2813_p13 = scmp.lt.s32.totalorder %s2807_s28, %s2807_s28 }
  0x2d   :  { %p2814_p0 = por %p2813_p13, %p2812_p12 }
  0x2f   :  { %p2815_p1 = pnand %p2814_p0, %p2808_p11 }
  0x31   :  { %2818 = shalt.err (!%p2815_p1)
}
  0x32   :  { %80 = dma.hbm_to_vmem [thread:$0]  %s3401_s5, 1024, %s75_s29, [#allocation9], %s3032_s23, %s3032_s23, %s3033_s24  }
  0x33   :  { %s2819_s16 = scalar_lea.hbm %s3406_s10, 1024 }
  0x34   :  { %p2820_p2 = scmp.ne.s32.totalorder %s3406_s10, %s2819_s16  ;;  %p2823_p3 = scmp.lt.u32.totalorder %s2819_s16, %s3406_s10 }
  0x36   :  { %p2825_p4 = pnand %p2823_p3, %p2820_p2 }
  0x38   :  { %2828 = shalt.err (!%p2825_p4)
}
  0x39   :  { %s2829_s21 = scalar_lea.vmem %s105_s19, 1024  ;;  %p2834_p6 = scmp.lt.s32.totalorder %s105_s19, %s105_s19 }
  0x3a   :  { %p2830_p5 = scmp.ne.s32.totalorder %s105_s19, %s2829_s21  ;;  %p2835_p7 = scmp.lt.s32.totalorder %s2829_s21, %s2829_s21 }
  0x3c   :  { %p2836_p8 = por %p2835_p7, %p2834_p6 }
  0x3e   :  { %p2837_p9 = pnand %p2836_p8, %p2830_p5 }
  0x40   :  { %2840 = shalt.err (!%p2837_p9)
}
  0x41   :  { %110 = dma.hbm_to_vmem [thread:$0]  %s3406_s10, 1024, %s105_s19, [#allocation12], %s3032_s23, %s3032_s23, %s3033_s24  }
  0x42   :  { %s3036_s22 = smov [#allocation2]   ;;  %s3037_s28 = smov [#allocation7]  }
  0x43   :  { %s37_s2 = sshll.u32 %s3036_s22, 4  ;;  %s60_s0 = sshll.u32 %s3037_s28, 4  ;;  %s38_s2 = int_to_ptr.vmem [resolvable:$true] %s37_s2  ;;  %s61_s0 = int_to_ptr.vmem [resolvable:$true] %s60_s0 }
  0x44   :  { %s3424_s15 = sld [smem:[#allocation27_spill]] }
  0x4a   :  { %s2841_s16 = scalar_lea.hbm %s3424_s15, 256 }
  0x4b   :  { %p2842_p10 = scmp.ne.s32.totalorder %s3424_s15, %s2841_s16  ;;  %p2845_p11 = scmp.lt.u32.totalorder %s2841_s16, %s3424_s15 }
  0x4d   :  { %p2847_p12 = pnand %p2845_p11, %p2842_p10 }
  0x4f   :  { %2850 = shalt.err (!%p2847_p12)
}
  0x50   :  { %s2851_s10 = scalar_lea.vmem %s38_s2, 256  ;;  %p2856_p0 = scmp.lt.s32.totalorder %s38_s2, %s38_s2 }
  0x51   :  { %p2852_p13 = scmp.ne.s32.totalorder %s38_s2, %s2851_s10  ;;  %p2857_p1 = scmp.lt.s32.totalorder %s2851_s10, %s2851_s10 }
  0x53   :  { %p2858_p2 = por %p2857_p1, %p2856_p0 }
  0x55   :  { %p2859_p3 = pnand %p2858_p2, %p2852_p13 }
  0x57   :  { %2862 = shalt.err (!%p2859_p3)
}
  0x58   :  { %40 = dma.hbm_to_vmem [thread:$0]  %s3424_s15, 256, %s38_s2, [#allocation3]  }
  0x59   :  { %s2863_s22 = scalar_lea.hbm %s3399_s3, 1024 }
  0x5a   :  { %p2864_p4 = scmp.ne.s32.totalorder %s3399_s3, %s2863_s22  ;;  %p2867_p5 = scmp.lt.u32.totalorder %s2863_s22, %s3399_s3 }
  0x5c   :  { %p2869_p6 = pnand %p2867_p5, %p2864_p4 }
  0x5e   :  { %2872 = shalt.err (!%p2869_p6)
}
  0x5f   :  { %s2873_s27 = scalar_lea.vmem %s61_s0, 1024  ;;  %p2878_p8 = scmp.lt.s32.totalorder %s61_s0, %s61_s0 }
  0x60   :  { %p2874_p7 = scmp.ne.s32.totalorder %s61_s0, %s2873_s27  ;;  %p2879_p9 = scmp.lt.s32.totalorder %s2873_s27, %s2873_s27 }
  0x62   :  { %p2880_p10 = por %p2879_p9, %p2878_p8 }
  0x64   :  { %p2881_p11 = pnand %p2880_p10, %p2874_p7 }
  0x66   :  { %2884 = shalt.err (!%p2881_p11)
}
  0x67   :  { %66 = dma.hbm_to_vmem [thread:$0]  %s3399_s3, 1024, %s61_s0, [#allocation6], %s3032_s23, %s3032_s23, %s3033_s24  }
  0x68   :  { %s3038_s30 = smov [#allocation10]   ;;  %s3039_s20 = smov [#allocation13]  }
  0x69   :  { %s88_s1 = sshll.u32 %s3038_s30, 4  ;;  %s118_s10 = sshll.u32 %s3039_s20, 4  ;;  %s89_s1 = int_to_ptr.vmem [resolvable:$true] %s88_s1  ;;  %s119_s10 = int_to_ptr.vmem [resolvable:$true] %s118_s10 }
  0x6a   :  { %s2885_s5 = scalar_lea.hbm %s3403_s7, 1024 }
  0x6b   :  { %p2886_p12 = scmp.ne.s32.totalorder %s3403_s7, %s2885_s5  ;;  %p2889_p13 = scmp.lt.u32.totalorder %s2885_s5, %s3403_s7 }
  0x6d   :  { %p2891_p0 = pnand %p2889_p13, %p2886_p12 }
  0x6f   :  { %2894 = shalt.err (!%p2891_p0)
}
  0x70   :  { %s2895_s3 = scalar_lea.vmem %s89_s1, 1024  ;;  %p2900_p2 = scmp.lt.s32.totalorder %s89_s1, %s89_s1 }
  0x71   :  { %p2896_p1 = scmp.ne.s32.totalorder %s89_s1, %s2895_s3  ;;  %p2901_p3 = scmp.lt.s32.totalorder %s2895_s3, %s2895_s3 }
  0x73   :  { %p2902_p4 = por %p2901_p3, %p2900_p2 }
  0x75   :  { %p2903_p5 = pnand %p2902_p4, %p2896_p1 }
  0x77   :  { %2906 = shalt.err (!%p2903_p5)
}
  0x78   :  { %94 = dma.hbm_to_vmem [thread:$0]  %s3403_s7, 1024, %s89_s1, [#allocation9], %s3032_s23, %s3032_s23, %s3033_s24  }
  0x79   :  { %s2907_s2 = scalar_lea.hbm %s3408_s12, 1024 }
  0x7a   :  { %p2908_p6 = scmp.ne.s32.totalorder %s3408_s12, %s2907_s2  ;;  %p2911_p7 = scmp.lt.u32.totalorder %s2907_s2, %s3408_s12 }
  0x7c   :  { %p2913_p8 = pnand %p2911_p7, %p2908_p6 }
  0x7e   :  { %2916 = shalt.err (!%p2913_p8)
}
  0x7f   :  { %s2917_s21 = scalar_lea.vmem %s119_s10, 1024  ;;  %p2922_p10 = scmp.lt.s32.totalorder %s119_s10, %s119_s10 }
  0x80   :  { %p2918_p9 = scmp.ne.s32.totalorder %s119_s10, %s2917_s21  ;;  %p2923_p11 = scmp.lt.s32.totalorder %s2917_s21, %s2917_s21 }
  0x82   :  { %p2924_p12 = por %p2923_p11, %p2922_p10 }
  0x84   :  { %p2925_p13 = pnand %p2924_p12, %p2918_p9 }
  0x86   :  { %2928 = shalt.err (!%p2925_p13)
}
  0x87   :  { %124 = dma.hbm_to_vmem [thread:$0]  %s3408_s12, 1024, %s119_s10, [#allocation12], %s3032_s23, %s3032_s23, %s3033_s24  }
  0x88   :  { %s3040_s5 = smov [#allocation14]   ;;  %s2929_s25 = scalar_lea.hbm %s3410_s14, 8192 }
  0x89   :  { %s132_s29 = sshll.u32 %s3040_s5, 4  ;;  %p2930_p0 = scmp.ne.s32.totalorder %s3410_s14, %s2929_s25  ;;  %s133_s29 = int_to_ptr.vmem [resolvable:$true] %s132_s29 }
  0x8a   :  { %p2933_p1 = scmp.lt.u32.totalorder %s2929_s25, %s3410_s14 }
  0x8c   :  { %p2935_p2 = pnand %p2933_p1, %p2930_p0 }
  0x8e   :  { %2938 = shalt.err (!%p2935_p2)
}
  0x8f   :  { %s2939_s27 = scalar_lea.vmem %s133_s29, 8192  ;;  %p2944_p4 = scmp.lt.s32.totalorder %s133_s29, %s133_s29 }
  0x90   :  { %p2940_p3 = scmp.ne.s32.totalorder %s133_s29, %s2939_s27  ;;  %p2945_p5 = scmp.lt.s32.totalorder %s2939_s27, %s2939_s27 }
  0x92   :  { %p2946_p6 = por %p2945_p5, %p2944_p4 }
  0x94   :  { %p2947_p7 = pnand %p2946_p6, %p2940_p3 }
  0x96   :  { %2950 = shalt.err (!%p2947_p7)
}
  0x97   :  { %s3041_s12 = smov 512   ;;  %s3042_s23 = smov 32  }
  0x98   :  { %138 = dma.hbm_to_vmem [thread:$0]  %s3410_s14, 8192, %s133_s29, [#allocation15], %s3041_s12, %s3041_s12, %s3042_s23  }
  0x99   :  { %3017 = dma.done.wait [#allocation3], 256  }
  0x9a   :  { %3018 = vsyncadd [#allocation3], 4294967040 }
  0x9b   :  { %3019 = dma.done.wait [#allocation6], 9216  }
  0x9c   :  { %3020 = vsyncadd [#allocation6], 4294958080 }
  0x9d   :  { %3021 = dma.done.wait [#allocation9], 2048  }
  0x9e   :  { %3022 = vsyncadd [#allocation9], 4294965248 }
  0x9f   :  { %3023 = dma.done.wait [#allocation12], 2048  }
  0xa0   :  { %3024 = vsyncadd [#allocation12], 4294965248 }
  0xa1   :  { %3025 = dma.done.wait [#allocation15], 8192  }
  0xa2   :  { %3026 = vsyncadd [#allocation15], 4294959104  ;;  %v2635_v0 = vld [vmem:[#allocation5 + $0x40] sm:$0xff]   ;;  %v2639_v4 = vld [vmem:[#allocation5 + $0x48] sm:$0xff]   ;;  %v3043_v22 = vmov 1983009808   ;;  %v174_v24 = vlaneseq }
  0xa3   :  { %v2636_v1 = vld [vmem:[#allocation5 + $0xc0] sm:$0xff]   ;;  %2383 = vmatprep.subr.bf16.mxu0 %v2635_v0  ;;  %v2640_v5 = vld [vmem:[#allocation5 + $0xc8] sm:$0xff]   ;;  %v2643_v8 = vld [vmem:[#allocation5 + $0x50] sm:$0xff]   ;;  %v172_v23 = vunpack.c.l.s4 %v3043_v22  ;;  %vm3045_vm0 = vmmov 0   ;;  %s3425_s15 = sld [smem:[#allocation29_spill]] }
  0xa4   :  { %v2637_v2 = vld [vmem:[#allocation5] sm:$0xff]   ;;  %2405 = vmatprep.subr.bf16.mxu1 %v2636_v1  ;;  %v2641_v6 = vld [vmem:[#allocation5 + $0x8] sm:$0xff]   ;;  %v2644_v9 = vld [vmem:[#allocation5 + $0xd0] sm:$0xff]   ;;  %v3259_v30 = vshrl.u32 %v174_v24, 7 }
  0xa5   :  { %v2638_v3 = vld [vmem:[#allocation5 + $0x80] sm:$0xff]   ;;  %2384 = vmatpush3.bf16.msra.mxu0 %v2637_v2  ;;  %v2642_v7 = vld [vmem:[#allocation5 + $0x88] sm:$0xff]   ;;  %v2645_v10 = vld [vmem:[#allocation5 + $0x10] sm:$0xff]   ;;  %v173_v29 = vunpack.c.0.s8 %v172_v23 }
  0xa6   :  { %2406 = vmatpush3.bf16.msra.mxu1 %v2638_v3  ;;  %2385 = vmatprep.subr.bf16.mxu0 %v2639_v4  ;;  %v2646_v11 = vld [vmem:[#allocation5 + $0x90] sm:$0xff]   ;;  %v2647_v12 = vld [vmem:[#allocation5 + $0x58] sm:$0xff]   ;;  %v2651_v16 = vld [vmem:[#allocation5 + $0x60] sm:$0xff]  }
  0xa7   :  { %2407 = vmatprep.subr.bf16.mxu1 %v2640_v5  ;;  %v2648_v13 = vld [vmem:[#allocation5 + $0xd8] sm:$0xff]   ;;  %v2652_v17 = vld [vmem:[#allocation5 + $0xe0] sm:$0xff]   ;;  %v2655_v20 = vld [vmem:[#allocation5 + $0x68] sm:$0xff]   ;;  %v3262_v35 = vsub.s32 %v173_v29, %v3259_v30 }
  0xa8   :  { %v2649_v14 = vld [vmem:[#allocation5 + $0x18] sm:$0xff]   ;;  %v2653_v18 = vld [vmem:[#allocation5 + $0x20] sm:$0xff]   ;;  %v2656_v21 = vld [vmem:[#allocation5 + $0xe8] sm:$0xff]  }
  0xa9   :  { %2386 = vmatpush3.bf16.msra.mxu0 %v2641_v6  ;;  %v2650_v15 = vld [vmem:[#allocation5 + $0x98] sm:$0xff]   ;;  %v2654_v19 = vld [vmem:[#allocation5 + $0xa0] sm:$0xff]   ;;  %v2657_v25 = vld [vmem:[#allocation5 + $0x28] sm:$0xff]  }
  0xaa   :  { %2408 = vmatpush3.bf16.msra.mxu1 %v2642_v7  ;;  %2387 = vmatprep.subr.bf16.mxu0 %v2643_v8  ;;  %v2658_v26 = vld [vmem:[#allocation5 + $0xa8] sm:$0xff]   ;;  %v2659_v27 = vld [vmem:[#allocation5 + $0x70] sm:$0xff]   ;;  %v2663_v33 = vld [vmem:[#allocation5 + $0x78] sm:$0xff]  }
  0xab   :  { %2409 = vmatprep.subr.bf16.mxu1 %v2644_v9  ;;  %v2660_v28 = vld [vmem:[#allocation5 + $0xf0] sm:$0xff]   ;;  %v2664_v34 = vld [vmem:[#allocation5 + $0xf8] sm:$0xff]   ;;  %v2668_v41 = vld [vmem:[#allocation5 + $0x140] sm:$0xff]  }
  0xac   :  { %v2661_v31 = vld [vmem:[#allocation5 + $0x30] sm:$0xff]   ;;  %v2665_v36 = vld [vmem:[#allocation5 + $0x38] sm:$0xff]   ;;  %v2669_v42 = vld [vmem:[#allocation5 + $0x1c0] sm:$0xff]  }
  0xad   :  { %2388 = vmatpush3.bf16.msra.mxu0 %v2645_v10  ;;  %v2662_v32 = vld [vmem:[#allocation5 + $0xb0] sm:$0xff]   ;;  %v2666_v37 = vld [vmem:[#allocation5 + $0xb8] sm:$0xff]   ;;  %v2670_v46 = vld [vmem:[#allocation5 + $0x100] sm:$0xff]  }
  0xae   :  { %2410 = vmatpush3.bf16.msra.mxu1 %v2646_v11  ;;  %2389 = vmatprep.subr.bf16.mxu0 %v2647_v12  ;;  %v166_v38 = vld [vmem:[#allocation2] sm:$0xff]  ;;  %v2671_v49 = vld [vmem:[#allocation5 + $0x180] sm:$0xff]   ;;  %v2672_v51 = vld [vmem:[#allocation5 + $0x148] sm:$0xff]  }
  0xaf   :  { %2411 = vmatprep.subr.bf16.mxu1 %v2648_v13  ;;  %v177_v39 = vrot.slane %v166_v38, %v3262_v35  ;;  %v170_v40 = vcombine.high %v166_v38, %v166_v38  ;;  %v2673_v53 = vld [vmem:[#allocation5 + $0x1c8] sm:$0xff]   ;;  %v2676_v56 = vld [vmem:[#allocation5 + $0x150] sm:$0xff]   ;;  %v2680_v60 = vld [vmem:[#allocation5 + $0x158] sm:$0xff]  }
  0xb0   :  { %v2674_v54 = vld [vmem:[#allocation5 + $0x108] sm:$0xff]   ;;  %v2677_v57 = vld [vmem:[#allocation5 + $0x1d0] sm:$0xff]   ;;  %v2681_v61 = vld [vmem:[#allocation5 + $0x1d8] sm:$0xff]  }
  0xb1   :  { %2390 = vmatpush3.bf16.msra.mxu0 %v2649_v14  ;;  %v185_v43 = vcombine.high %v177_v39, %v177_v39  ;;  %v184_v44 = vrot.slane %v170_v40, %v3262_v35  ;;  %v212_v45 = vpack.c.bf16 %v177_v39, %v177_v39  ;;  %v2675_v55 = vld [vmem:[#allocation5 + $0x188] sm:$0xff]   ;;  %v2678_v58 = vld [vmem:[#allocation5 + $0x110] sm:$0xff]   ;;  %v2682_v62 = vld [vmem:[#allocation5 + $0x118] sm:$0xff]  }
  0xb2   :  { %2412 = vmatpush3.bf16.msra.mxu1 %v2650_v15  ;;  %2391 = vmatprep.subr.bf16.mxu0 %v2651_v16  ;;  %v2679_v59 = vld [vmem:[#allocation5 + $0x190] sm:$0xff]   ;;  %v2683_v63 = vld [vmem:[#allocation5 + $0x198] sm:$0xff]   ;;  %v2684_v0 = vld [vmem:[#allocation5 + $0x160] sm:$0xff]  }
  0xb3   :  { %2413 = vmatprep.subr.bf16.mxu1 %v2652_v17  ;;  %v213_v47 = vpack.c.bf16 %v185_v43, %v185_v43  ;;  %v186_v48 = vcombine.high %v184_v44, %v184_v44  ;;  %v214_v50 = vpack.c.bf16 %v184_v44, %v184_v44  ;;  %v2685_v1 = vld [vmem:[#allocation5 + $0x1e0] sm:$0xff]   ;;  %v2688_v4 = vld [vmem:[#allocation5 + $0x168] sm:$0xff]   ;;  %v2692_v8 = vld [vmem:[#allocation5 + $0x170] sm:$0xff]  }
  0xb4   :  { %v2686_v2 = vld [vmem:[#allocation5 + $0x120] sm:$0xff]   ;;  %v2689_v5 = vld [vmem:[#allocation5 + $0x1e8] sm:$0xff]   ;;  %v2693_v9 = vld [vmem:[#allocation5 + $0x1f0] sm:$0xff]  }
  0xb5   :  { %2392 = vmatpush3.bf16.msra.mxu0 %v2653_v18  ;;  %771 = vmatprep.mubr.bf16.mxu0 %v213_v47  ;;  %v215_v52 = vpack.c.bf16 %v186_v48, %v186_v48  ;;  %v2687_v3 = vld [vmem:[#allocation5 + $0x1a0] sm:$0xff]   ;;  %v2690_v6 = vld [vmem:[#allocation5 + $0x128] sm:$0xff]   ;;  %v2694_v10 = vld [vmem:[#allocation5 + $0x130] sm:$0xff]  }
  0xb6   :  { %2414 = vmatpush3.bf16.msra.mxu1 %v2654_v19  ;;  %2393 = vmatprep.subr.bf16.mxu0 %v2655_v20  ;;  %v2691_v7 = vld [vmem:[#allocation5 + $0x1a8] sm:$0xff]   ;;  %v2695_v11 = vld [vmem:[#allocation5 + $0x1b0] sm:$0xff]   ;;  %v2696_v12 = vld [vmem:[#allocation5 + $0x178] sm:$0xff]  }
  0xb7   :  { %2415 = vmatprep.subr.bf16.mxu1 %v2656_v21  ;;  %811 = vmatprep.mubr.bf16.mxu1 %v215_v52  ;;  %v2697_v13 = vld [vmem:[#allocation5 + $0x1f8] sm:$0xff]   ;;  %v2703_v29 = vld [vmem:[#allocation7 + $0x10] sm:$0xff]   ;;  %v2711_v38 = vld [vmem:[#allocation8 + $0x8] sm:$0xff]  }
  0xb8   :  { %v2698_v14 = vld [vmem:[#allocation5 + $0x138] sm:$0xff]   ;;  %v2713_v39 = vld [vmem:[#allocation8 + $0x10] sm:$0xff]  }
  0xb9   :  { %2394 = vmatpush3.bf16.msra.mxu0 %v2657_v25  ;;  %v167_v15 = vld [vmem:[#allocation2 + $0x8] sm:$0xff]  ;;  %v2201_v44 = vld [vmem:[%s3425_s15] ss:$0 sm:$0xff] }
  0xba   :  { %2416 = vmatpush3.bf16.msra.mxu1 %v2658_v26  ;;  %2395 = vmatprep.subr.bf16.mxu0 %v2659_v27  ;;  %v2699_v16 = vld [vmem:[#allocation5 + $0x1b8] sm:$0xff]   ;;  %v194_v17 = vrot.slane %v167_v15, %v3262_v35  ;;  %v187_v18 = vcombine.high %v167_v15, %v167_v15  ;;  %v2701_v26 = vld [vmem:[#allocation7] sm:$0xff]   ;;  %v3044_v27 = vmov 0.0  }
  0xbb   :  { %2417 = vmatprep.subr.bf16.mxu1 %v2660_v28  ;;  %v2702_v28 = vld [vmem:[#allocation7 + $0x8] sm:$0xff]   ;;  %v2715_v40 = vld [vmem:[#allocation8 + $0x18] sm:$0xff]  }
  0xbc   :  { %v202_v19 = vcombine.high %v194_v17, %v194_v17  ;;  %v201_v20 = vrot.slane %v187_v18, %v3262_v35  ;;  %v216_v21 = vpack.c.bf16 %v194_v17, %v194_v17  ;;  %v2724_v15 = vld [vmem:[#allocation10 + $0x38] sm:$0xff]  }
  0xbd   :  { %2396 = vmatpush3.bf16.msra.mxu0 %v2661_v31  ;;  %v2704_v31 = vld [vmem:[#allocation7 + $0x18] sm:$0xff]  }
  0xbe   :  { %2418 = vmatpush3.bf16.msra.mxu1 %v2662_v32  ;;  %2397 = vmatprep.subr.bf16.mxu0 %v2663_v33  ;;  %v217_v22 = vpack.c.bf16 %v202_v19, %v202_v19  ;;  %v203_v23 = vcombine.high %v201_v20, %v201_v20  ;;  %v218_v24 = vpack.c.bf16 %v201_v20, %v201_v20  ;;  %v2705_v32 = vld [vmem:[#allocation7 + $0x20] sm:$0xff]   ;;  %v2706_v33 = vld [vmem:[#allocation7 + $0x28] sm:$0xff]  }
  0xbf   :  { %2419 = vmatprep.subr.bf16.mxu1 %v2664_v34  ;;  %v2707_v34 = vld [vmem:[#allocation7 + $0x30] sm:$0xff]  }
  0xc0   :  { %v219_v25 = vpack.c.bf16 %v203_v23, %v203_v23  ;;  %v2725_v23 = vld [vmem:[#allocation11] sm:$0xff]  }
  0xc1   :  { %2398 = vmatpush3.bf16.msra.mxu0 %v2665_v36  ;;  %v2708_v36 = vld [vmem:[#allocation7 + $0x38] sm:$0xff]  }
  0xc2   :  { %2420 = vmatpush3.bf16.msra.mxu1 %v2666_v37  ;;  %2427 = vmatprep.subr.bf16.mxu0 %v2668_v41  ;;  %v2709_v37 = vld [vmem:[#allocation8] sm:$0xff]  }
  0xc3   :  { %2449 = vmatprep.subr.bf16.mxu1 %v2669_v42  ;;  %v2717_v41 = vld [vmem:[#allocation8 + $0x20] sm:$0xff]   ;;  %v2719_v42 = vld [vmem:[#allocation8 + $0x28] sm:$0xff]  }
  0xc4   :  { %772 = vmatmul.mubr.bf16.vlgmr.msra.gmra.mrb[0].mxu0 %v212_v45 }
  0xc5   :  { %2428 = vmatpush3.bf16.msra.mxu0 %v2670_v46  ;;  %812 = vmatmul.mubr.bf16.vlgmr.msra.gmra.mrb[0].mxu1 %v214_v50 }
  0xc6   :  { %2429 = vmatprep.subr.bf16.mxu0 %v2672_v51  ;;  %2450 = vmatpush3.bf16.msra.mxu1 %v2671_v49 }
  0xc7   :  { %2451 = vmatprep.subr.bf16.mxu1 %v2673_v53  ;;  %851 = vmatprep.mubr.bf16.mxu0 %v217_v22 }
  0xc8   :  { %891 = vmatprep.mubr.bf16.mxu1 %v219_v25  ;;  %v2726_v25 = vld [vmem:[#allocation11 + $0x8] sm:$0xff]  }
  0xc9   :  { %2430 = vmatpush3.bf16.msra.mxu0 %v2674_v54 }
  0xca   :  { %2431 = vmatprep.subr.bf16.mxu0 %v2676_v56  ;;  %2452 = vmatpush3.bf16.msra.mxu1 %v2675_v55 }
  0xcb   :  { %2453 = vmatprep.subr.bf16.mxu1 %v2677_v57 }
  0xcd   :  { %2432 = vmatpush3.bf16.msra.mxu0 %v2678_v58 }
  0xce   :  { %2433 = vmatprep.subr.bf16.mxu0 %v2680_v60  ;;  %2454 = vmatpush3.bf16.msra.mxu1 %v2679_v59 }
  0xcf   :  { %2455 = vmatprep.subr.bf16.mxu1 %v2681_v61 }
  0xd1   :  { %2434 = vmatpush3.bf16.msra.mxu0 %v2682_v62 }
  0xd2   :  { %2435 = vmatprep.subr.bf16.mxu0 %v2684_v0  ;;  %2456 = vmatpush3.bf16.msra.mxu1 %v2683_v63 }
  0xd3   :  { %2457 = vmatprep.subr.bf16.mxu1 %v2685_v1 }
  0xd5   :  { %2436 = vmatpush3.bf16.msra.mxu0 %v2686_v2 }
  0xd6   :  { %2437 = vmatprep.subr.bf16.mxu0 %v2688_v4  ;;  %2458 = vmatpush3.bf16.msra.mxu1 %v2687_v3 }
  0xd7   :  { %2459 = vmatprep.subr.bf16.mxu1 %v2689_v5  ;;  %v2710_v5 = vld [vmem:[#allocation10] sm:$0xff]  }
  0xd9   :  { %2438 = vmatpush3.bf16.msra.mxu0 %v2690_v6 }
  0xda   :  { %2439 = vmatprep.subr.bf16.mxu0 %v2692_v8  ;;  %2460 = vmatpush3.bf16.msra.mxu1 %v2691_v7  ;;  %v2712_v7 = vld [vmem:[#allocation10 + $0x8] sm:$0xff]   ;;  %v2714_v8 = vld [vmem:[#allocation10 + $0x10] sm:$0xff]  }
  0xdb   :  { %2461 = vmatprep.subr.bf16.mxu1 %v2693_v9  ;;  %v2716_v9 = vld [vmem:[#allocation10 + $0x18] sm:$0xff]  }
  0xdd   :  { %2440 = vmatpush3.bf16.msra.mxu0 %v2694_v10  ;;  %v2718_v10 = vld [vmem:[#allocation10 + $0x20] sm:$0xff]  }
  0xde   :  { %2441 = vmatprep.subr.bf16.mxu0 %v2696_v12  ;;  %2462 = vmatpush3.bf16.msra.mxu1 %v2695_v11  ;;  %v2720_v11 = vld [vmem:[#allocation10 + $0x28] sm:$0xff]   ;;  %v2721_v12 = vld [vmem:[#allocation8 + $0x30] sm:$0xff]  }
  0xdf   :  { %2463 = vmatprep.subr.bf16.mxu1 %v2697_v13  ;;  %v2722_v13 = vld [vmem:[#allocation10 + $0x30] sm:$0xff]  }
  0xe1   :  { %2442 = vmatpush3.bf16.msra.mxu0 %v2698_v14  ;;  %v2723_v14 = vld [vmem:[#allocation8 + $0x38] sm:$0xff]  }
  0xe2   :  { %2464 = vmatpush3.bf16.msra.mxu1 %v2699_v16  ;;  %2516 = vmatprep.subr.bf16.mxu0 %v3044_v27  ;;  %v2266_v16 = vld [vmem:[%s3400_s4] ss:$0 sm:$0xff] }
  0xe3   :  { %2536 = vmatprep.subr.bf16.mxu1 %v3044_v27 }
  0xe4   :  { %852 = vmatmul.mubr.bf16.vlgmr.msra.gmra.mrb[4].mxu0 %v216_v21 }
  0xe5   :  { %892 = vmatmul.mubr.bf16.vlgmr.msra.gmra.mrb[4].mxu1 %v218_v24  ;;  %2517 = vmatpush3.bf16.msra.mxu0 %v2701_v26  ;;  %v2727_v26 = vld [vmem:[#allocation11 + $0x10] sm:$0xff]  }
  0xe6   :  { %2518 = vmatprep.subr.bf16.mxu0 %v3044_v27  ;;  %2532 = vmatprep.mubr.msk.bf16.mxu0 %vm3045_vm0, %v3044_v27 }
  0xe7   :  { %2552 = vmatprep.mubr.msk.bf16.mxu1 %vm3045_vm0, %v3044_v27  ;;  %2537 = vmatpush3.bf16.msra.mxu1 %v2709_v37  ;;  %v2735_v37 = vld [vmem:[#allocation13 + $0x10] sm:$0xff]  }
  0xe8   :  { %2538 = vmatprep.subr.bf16.mxu1 %v3044_v27 }
  0xe9   :  { %2519 = vmatpush3.bf16.msra.mxu0 %v2702_v28  ;;  %v2728_v28 = vld [vmem:[#allocation11 + $0x18] sm:$0xff]  }
  0xea   :  { %2520 = vmatprep.subr.bf16.mxu0 %v3044_v27 }
  0xeb   :  { %2539 = vmatpush3.bf16.msra.mxu1 %v2711_v38  ;;  %v2736_v38 = vld [vmem:[#allocation13 + $0x18] sm:$0xff]  }
  0xec   :  { %2540 = vmatprep.subr.bf16.mxu1 %v3044_v27 }
  0xed   :  { %2521 = vmatpush3.bf16.msra.mxu0 %v2703_v29  ;;  %v2729_v29 = vld [vmem:[#allocation11 + $0x20] sm:$0xff]  }
  0xee   :  { %2522 = vmatprep.subr.bf16.mxu0 %v3044_v27 }
  0xef   :  { %2541 = vmatpush3.bf16.msra.mxu1 %v2713_v39  ;;  %v2737_v39 = vld [vmem:[#allocation13 + $0x20] sm:$0xff]  }
  0xf0   :  { %2542 = vmatprep.subr.bf16.mxu1 %v3044_v27 }
  0xf1   :  { %2523 = vmatpush3.bf16.msra.mxu0 %v2704_v31  ;;  %v2730_v31 = vld [vmem:[#allocation11 + $0x28] sm:$0xff]  }
  0xf2   :  { %2524 = vmatprep.subr.bf16.mxu0 %v3044_v27 }
  0xf3   :  { %2543 = vmatpush3.bf16.msra.mxu1 %v2715_v40  ;;  %v2738_v40 = vld [vmem:[#allocation13 + $0x28] sm:$0xff]  }
  0xf4   :  { %2544 = vmatprep.subr.bf16.mxu1 %v3044_v27 }
  0xf5   :  { %2525 = vmatpush3.bf16.msra.mxu0 %v2705_v32  ;;  %v2731_v32 = vld [vmem:[#allocation11 + $0x30] sm:$0xff]  }
  0xf6   :  { %2526 = vmatprep.subr.bf16.mxu0 %v3044_v27 }
  0xf7   :  { %2545 = vmatpush3.bf16.msra.mxu1 %v2717_v41  ;;  %v2275_v41 = vld [vmem:[%s3402_s6] ss:$0 sm:$0xff] }
  0xf8   :  { %2546 = vmatprep.subr.bf16.mxu1 %v3044_v27 }
  0xf9   :  { %2527 = vmatpush3.bf16.msra.mxu0 %v2706_v33  ;;  %v2732_v33 = vld [vmem:[#allocation11 + $0x38] sm:$0xff]  }
  0xfa   :  { %2528 = vmatprep.subr.bf16.mxu0 %v3044_v27 }
  0xfb   :  { %2547 = vmatpush3.bf16.msra.mxu1 %v2719_v42  ;;  %v2284_v42 = vld [vmem:[%s3404_s8] ss:$0 sm:$0xff] }
  0xfc   :  { %2548 = vmatprep.subr.bf16.mxu1 %v3044_v27 }
  0xfd   :  { %2529 = vmatpush3.bf16.msra.mxu0 %v2707_v34  ;;  %v2733_v34 = vld [vmem:[#allocation13] sm:$0xff]  }
  0xfe   :  { %2530 = vmatprep.subr.bf16.mxu0 %v3044_v27 }
  0xff   :  { %2549 = vmatpush3.bf16.msra.mxu1 %v2721_v12 }
 0x100   :  { %2550 = vmatprep.subr.bf16.mxu1 %v3044_v27 }
 0x101   :  { %2531 = vmatpush3.bf16.msra.mxu0 %v2708_v36  ;;  %v2734_v36 = vld [vmem:[#allocation13 + $0x8] sm:$0xff]  }
 0x102   :  { %2556 = vmatprep.subr.bf16.mxu0 %v3044_v27 }
 0x103   :  { %2551 = vmatpush3.bf16.msra.mxu1 %v2723_v14  ;;  %v1497_v14 = vld [vmem:[#allocation14 + $0xe0] sm:$0xff] }
 0x104   :  { %2576 = vmatprep.subr.bf16.mxu1 %v3044_v27 }
 0x197   :  { %v2399_v43 = vpop.f32.mrb[0].mxu0 }
 0x198   :  { %v2400_v45 = vpop.f32.mrb[1].mxu0  ;;  %v2421_v46 = vpop.f32.mrb[0].mxu1 }
 0x199   :  { %v2401_v47 = vadd.f32 %v2400_v45, %v2399_v43  ;;  %v2402_v48 = vpop.f32.mrb[2].mxu0  ;;  %v2422_v49 = vpop.f32.mrb[1].mxu1 }
 0x19a   :  { %v2403_v50 = vpop.f32.mrb[3].mxu0  ;;  %v2423_v52 = vadd.f32 %v2422_v49, %v2421_v46  ;;  %v2424_v53 = vpop.f32.mrb[2].mxu1 }
 0x19b   :  { %v774_v51 = vadd.f32 %v2401_v47, %v2201_v44  ;;  %v2425_v54 = vpop.f32.mrb[3].mxu1 }
 0x19d   :  { %v814_v55 = vadd.f32 %v2423_v52, %v774_v51 }
 0x1b7   :  { %v2443_v56 = vpop.f32.mrb[4].mxu0 }
 0x1b8   :  { %v2444_v57 = vpop.f32.mrb[5].mxu0  ;;  %v2465_v58 = vpop.f32.mrb[4].mxu1 }
 0x1b9   :  { %v2445_v59 = vadd.f32 %v2444_v57, %v2443_v56  ;;  %v2446_v60 = vpop.f32.mrb[6].mxu0  ;;  %v2466_v61 = vpop.f32.mrb[5].mxu1 }
 0x1ba   :  { %v2447_v62 = vpop.f32.mrb[7].mxu0  ;;  %v2467_v0 = vadd.f32 %v2466_v61, %v2465_v58  ;;  %v2468_v1 = vpop.f32.mrb[6].mxu1  ;;  %v2739_v60 = vld [vmem:[#allocation13 + $0x30] sm:$0xff]   ;;  %v2740_v61 = vld [vmem:[#allocation13 + $0x38] sm:$0xff]  }
 0x1bb   :  { %v854_v63 = vadd.f32 %v2445_v59, %v814_v55  ;;  %v2469_v2 = vpop.f32.mrb[7].mxu1  ;;  %v1236_v55 = vld [vmem:[%s3405_s9] sm:$0x3]  ;;  %v1469_v62 = vld [vmem:[#allocation14] sm:$0xff] }
 0x1bd   :  { %v894_v3 = vadd.f32 %v2467_v0, %v854_v63  ;;  %v1473_v63 = vld [vmem:[#allocation14 + $0x20] sm:$0xff]  ;;  %v1470_v0 = vld [vmem:[#allocation14 + $0x8] sm:$0xff] }
 0x1be   :  { %v2311_v1 = vcombine.low %v1469_v62, %v1473_v63  ;;  %v2312_v2 = vcombine.high %v1469_v62, %v1473_v63 }
 0x1bf   :  { %v899_v4 = vmax.f32 %v894_v3, 0.0  ;;  %v1474_v3 = vld [vmem:[#allocation14 + $0x28] sm:$0xff] }
 0x1c1   :  { %v900_v6 = vpack.c.bf16 %v899_v4, %v899_v4  ;;  %v1477_v4 = vld [vmem:[#allocation14 + $0x40] sm:$0xff] }
 0x1c3   :  { %2533 = vmatmul.mubr.bf16.vlgmr.msra.gmra.mrb[8].mxu0 %v900_v6  ;;  %v2313_v6 = vcombine.low %v1470_v0, %v1474_v3 }
 0x1c4   :  { %2557 = vmatpush3.bf16.msra.mxu0 %v2710_v5  ;;  %2572 = vmatprep.mubr.msk.bf16.mxu0 %vm3045_vm0, %v3044_v27  ;;  %v1481_v5 = vld [vmem:[#allocation14 + $0x60] sm:$0xff] }
 0x1c5   :  { %2558 = vmatprep.subr.bf16.mxu0 %v3044_v27 }
 0x1c8   :  { %2559 = vmatpush3.bf16.msra.mxu0 %v2712_v7  ;;  %v2314_v7 = vcombine.high %v1470_v0, %v1474_v3  ;;  %v1525_v0 = vld [vmem:[#allocation14 + $0x1c0] sm:$0xff] }
 0x1c9   :  { %2560 = vmatprep.subr.bf16.mxu0 %v3044_v27 }
 0x1cc   :  { %2561 = vmatpush3.bf16.msra.mxu0 %v2714_v8  ;;  %v2320_v8 = vcombine.high %v1477_v4, %v1481_v5 }
 0x1cd   :  { %2562 = vmatprep.subr.bf16.mxu0 %v3044_v27 }
 0x1d0   :  { %2563 = vmatpush3.bf16.msra.mxu0 %v2716_v9  ;;  %v2319_v9 = vcombine.low %v1477_v4, %v1481_v5  ;;  %v1530_v4 = vld [vmem:[#allocation14 + $0x1e8] sm:$0xff] }
 0x1d1   :  { %2564 = vmatprep.subr.bf16.mxu0 %v3044_v27 }
 0x1d4   :  { %2565 = vmatpush3.bf16.msra.mxu0 %v2718_v10  ;;  %v1485_v10 = vld [vmem:[#allocation14 + $0x80] sm:$0xff] }
 0x1d5   :  { %2566 = vmatprep.subr.bf16.mxu0 %v3044_v27 }
 0x1d8   :  { %2567 = vmatpush3.bf16.msra.mxu0 %v2720_v11 }
 0x1d9   :  { %2568 = vmatprep.subr.bf16.mxu0 %v3044_v27 }
 0x1dc   :  { %2569 = vmatpush3.bf16.msra.mxu0 %v2722_v13  ;;  %v1493_v13 = vld [vmem:[#allocation14 + $0xc0] sm:$0xff] }
 0x1dd   :  { %2570 = vmatprep.subr.bf16.mxu0 %v3044_v27 }
 0x1e0   :  { %2571 = vmatpush3.bf16.msra.mxu0 %v2724_v15  ;;  %v2336_v15 = vcombine.high %v1493_v13, %v1497_v14 }
 0x1e1   :  { %2596 = vmatprep.subr.bf16.mxu0 %v3044_v27 }
 0x296   :  { %v1006_v17 = vpop.f32.mrb[8].mxu0 }
 0x297   :  { %v1007_v18 = vadd.f32 %v2266_v16, %v1006_v17  ;;  %v2534_v19 = vpop.f32.mrb[9].mxu0  ;;  %v2335_v16 = vcombine.low %v1493_v13, %v1497_v14  ;;  %v1501_v17 = vld [vmem:[#allocation14 + $0x100] sm:$0xff]  ;;  %v1476_v13 = vld [vmem:[#allocation14 + $0x38] sm:$0xff] }
 0x298   :  { %v1009_v20 = vpop.f32.mrb[10].mxu0 }
 0x299   :  { %v1012_v21 = vmax.f32 %v1007_v18, 0.0  ;;  %v2535_v22 = vpop.f32.mrb[11].mxu0  ;;  %v1505_v18 = vld [vmem:[#allocation14 + $0x120] sm:$0xff] }
 0x29a   :  { %v2344_v19 = vcombine.high %v1501_v17, %v1505_v18  ;;  %v2343_v20 = vcombine.low %v1501_v17, %v1505_v18  ;;  %v1513_v22 = vld [vmem:[#allocation14 + $0x160] sm:$0xff] }
 0x29b   :  { %v1013_v24 = vpack.c.bf16 %v1012_v21, %v1012_v21  ;;  %v1509_v21 = vld [vmem:[#allocation14 + $0x140] sm:$0xff] }
 0x29d   :  { %2553 = vmatmul.mubr.bf16.vlgmr.msra.gmra.mrb[8].mxu1 %v1013_v24  ;;  %2573 = vmatmul.mubr.bf16.vlgmr.msra.gmra.mrb[12].mxu0 %v1013_v24  ;;  %v2351_v24 = vcombine.low %v1509_v21, %v1513_v22 }
 0x29e   :  { %2577 = vmatpush3.bf16.msra.mxu1 %v2725_v23  ;;  %2592 = vmatprep.mubr.msk.bf16.mxu1 %vm3045_vm0, %v3044_v27  ;;  %v2352_v23 = vcombine.high %v1509_v21, %v1513_v22  ;;  %v1483_v22 = vld [vmem:[#allocation14 + $0x70] sm:$0xff] }
 0x29f   :  { %2578 = vmatprep.subr.bf16.mxu1 %v3044_v27  ;;  %2612 = vmatprep.mubr.msk.bf16.mxu0 %vm3045_vm0, %v3044_v27 }
 0x2a0   :  { %2597 = vmatpush3.bf16.msra.mxu0 %v2733_v34 }
 0x2a1   :  { %2598 = vmatprep.subr.bf16.mxu0 %v3044_v27 }
 0x2a2   :  { %2579 = vmatpush3.bf16.msra.mxu1 %v2726_v25  ;;  %v1517_v25 = vld [vmem:[#allocation14 + $0x180] sm:$0xff] }
 0x2a3   :  { %2580 = vmatprep.subr.bf16.mxu1 %v3044_v27 }
 0x2a4   :  { %2599 = vmatpush3.bf16.msra.mxu0 %v2734_v36 }
 0x2a5   :  { %2600 = vmatprep.subr.bf16.mxu0 %v3044_v27 }
 0x2a6   :  { %2581 = vmatpush3.bf16.msra.mxu1 %v2727_v26  ;;  %v1521_v26 = vld [vmem:[#allocation14 + $0x1a0] sm:$0xff] }
 0x2a7   :  { %2582 = vmatprep.subr.bf16.mxu1 %v3044_v27 }
 0x2a8   :  { %2601 = vmatpush3.bf16.msra.mxu0 %v2735_v37  ;;  %v1478_v37 = vld [vmem:[#allocation14 + $0x48] sm:$0xff] }
 0x2a9   :  { %2602 = vmatprep.subr.bf16.mxu0 %v3044_v27 }
 0x2aa   :  { %2583 = vmatpush3.bf16.msra.mxu1 %v2728_v28  ;;  %v2360_v28 = vcombine.high %v1517_v25, %v1521_v26 }
 0x2ab   :  { %2584 = vmatprep.subr.bf16.mxu1 %v3044_v27 }
 0x2ac   :  { %2603 = vmatpush3.bf16.msra.mxu0 %v2736_v38  ;;  %v1482_v38 = vld [vmem:[#allocation14 + $0x68] sm:$0xff] }
 0x2ad   :  { %2604 = vmatprep.subr.bf16.mxu0 %v3044_v27 }
 0x2ae   :  { %2585 = vmatpush3.bf16.msra.mxu1 %v2729_v29  ;;  %v2359_v29 = vcombine.low %v1517_v25, %v1521_v26 }
 0x2af   :  { %2586 = vmatprep.subr.bf16.mxu1 %v3044_v27 }
 0x2b0   :  { %2605 = vmatpush3.bf16.msra.mxu0 %v2737_v39 }
 0x2b1   :  { %2606 = vmatprep.subr.bf16.mxu0 %v3044_v27 }
 0x2b2   :  { %2587 = vmatpush3.bf16.msra.mxu1 %v2730_v31  ;;  %v2293_v31 = vld [vmem:[%s3407_s11] ss:$0 sm:$0xff] }
 0x2b3   :  { %2588 = vmatprep.subr.bf16.mxu1 %v3044_v27 }
 0x2b4   :  { %2607 = vmatpush3.bf16.msra.mxu0 %v2738_v40 }
 0x2b5   :  { %2608 = vmatprep.subr.bf16.mxu0 %v3044_v27 }
 0x2b6   :  { %2589 = vmatpush3.bf16.msra.mxu1 %v2731_v32 }
 0x2b7   :  { %2590 = vmatprep.subr.bf16.mxu1 %v3044_v27 }
 0x2b8   :  { %2609 = vmatpush3.bf16.msra.mxu0 %v2739_v60  ;;  %v1522_v60 = vld [vmem:[#allocation14 + $0x1a8] sm:$0xff] }
 0x2b9   :  { %2610 = vmatprep.subr.bf16.mxu0 %v3044_v27  ;;  %v1489_v27 = vld [vmem:[#allocation14 + $0xa0] sm:$0xff] }
 0x2ba   :  { %2591 = vmatpush3.bf16.msra.mxu1 %v2732_v33  ;;  %v2328_v11 = vcombine.high %v1485_v10, %v1489_v27  ;;  %v2327_v12 = vcombine.low %v1485_v10, %v1489_v27  ;;  %v1472_v10 = vld [vmem:[#allocation14 + $0x18] sm:$0xff]  ;;  %v3046_v27 = vmov 0  }
 0x2bb   :  { %1895 = vmatprep.subr.bf16.mxu1 %v2312_v2  ;;  %v1526_v2 = vld [vmem:[#allocation14 + $0x1c8] sm:$0xff]  ;;  %v2317_v14 = vcombine.low %v1472_v10, %v1476_v13 }
 0x2bc   :  { %2611 = vmatpush3.bf16.msra.mxu0 %v2740_v61 }
 0x2bd   :  { %1936 = vmatprep.subr.bf16.mxu0 %v2314_v7  ;;  %v2370_v7 = vcombine.high %v1526_v2, %v1530_v4 }
 0x370   :  { %v1119_v43 = vpop.f32.mrb[8].mxu1  ;;  %v1230_v44 = vpop.f32.mrb[12].mxu0 }
 0x371   :  { %v1120_v45 = vadd.f32 %v2275_v41, %v1119_v43  ;;  %v1231_v46 = vadd.f32 %v2284_v42, %v1230_v44  ;;  %v2554_v47 = vpop.f32.mrb[9].mxu1  ;;  %v2574_v48 = vpop.f32.mrb[13].mxu0  ;;  %v2322_v42 = vcombine.high %v1478_v37, %v1482_v38  ;;  %v1486_v43 = vld [vmem:[#allocation14 + $0x88] sm:$0xff] }
 0x372   :  { %v1122_v49 = vpop.f32.mrb[10].mxu1  ;;  %v1233_v50 = vpop.f32.mrb[14].mxu0  ;;  %v1490_v44 = vld [vmem:[#allocation14 + $0xa8] sm:$0xff] }
 0x373   :  { %2153 = vst [vmem:[#allocation17] sm:$0x3] %v1120_v45  ;;  %v1237_v51 = vmul.f32 0.5, %v1231_v46  ;;  %2154 = vst [vmem:[#allocation19] sm:$0x3] %v1231_v46  ;;  %v2555_v52 = vpop.f32.mrb[11].mxu1  ;;  %v2330_v46 = vcombine.high %v1486_v43, %v1490_v44  ;;  %v2329_v49 = vcombine.low %v1486_v43, %v1490_v44 }
 0x374   :  { %v2575_v53 = vpop.f32.mrb[15].mxu0  ;;  %v1494_v47 = vld [vmem:[#allocation14 + $0xc8] sm:$0xff]  ;;  %v1496_v43 = vld [vmem:[#allocation14 + $0xd8] sm:$0xff] }
 0x375   :  { %v1238_v54 = vmul.f32 1.442695, %v1237_v51  ;;  %v1498_v48 = vld [vmem:[#allocation14 + $0xe8] sm:$0xff]  ;;  %v1500_v44 = vld [vmem:[#allocation14 + $0xf8] sm:$0xff] }
 0x376   :  { %v2338_v50 = vcombine.high %v1494_v47, %v1498_v48  ;;  %v1502_v51 = vld [vmem:[#allocation14 + $0x108] sm:$0xff]  ;;  %v2337_v53 = vcombine.low %v1494_v47, %v1498_v48  ;;  %v2342_v48 = vcombine.high %v1496_v43, %v1500_v44 }
 0x377   :  { %2741 = vpow2.f32 %v1238_v54  ;;  %v1506_v52 = vld [vmem:[#allocation14 + $0x128] sm:$0xff] }
 0x378   :  { %v2346_v54 = vcombine.high %v1502_v51, %v1506_v52 }
 0x381   :  { %v2742_v56 = vpop.eup %2741 }
 0x382   :  { %v1240_v57 = vmul.f32 %v2742_v56, %v1236_v55  ;;  %v1510_v55 = vld [vmem:[#allocation14 + $0x148] sm:$0xff] }
 0x383   :  { %v1514_v56 = vld [vmem:[#allocation14 + $0x168] sm:$0xff] }
 0x384   :  { %v1241_v58 = vadd.f32 %v1240_v57, %v1120_v45  ;;  %v2321_v45 = vcombine.low %v1478_v37, %v1482_v38  ;;  %v2345_v57 = vcombine.low %v1502_v51, %v1506_v52  ;;  %v2353_v61 = vcombine.low %v1510_v55, %v1514_v56  ;;  %v1504_v51 = vld [vmem:[#allocation14 + $0x118] sm:$0xff] }
 0x385   :  { %v1508_v52 = vld [vmem:[#allocation14 + $0x138] sm:$0xff] }
 0x386   :  { %v1242_v59 = vpack.c.bf16 %v1241_v58, %v1241_v58  ;;  %v2354_v58 = vcombine.high %v1510_v55, %v1514_v56  ;;  %v2350_v56 = vcombine.high %v1504_v51, %v1508_v52 }
 0x388   :  { %2593 = vmatmul.mubr.bf16.vlgmr.msra.gmra.mrb[12].mxu1 %v1242_v59  ;;  %v1518_v59 = vld [vmem:[#allocation14 + $0x188] sm:$0xff] }
 0x389   :  { %1896 = vmatpush1.bf16.msra.mxu1 %v2311_v1  ;;  %v2362_v62 = vcombine.high %v1518_v59, %v1522_v60  ;;  %v2361_v63 = vcombine.low %v1518_v59, %v1522_v60  ;;  %v1529_v1 = vld [vmem:[#allocation14 + $0x1e0] sm:$0xff]  ;;  %1927 = vmatprep.mubr.bf16.mxu1 %v3046_v27  ;;  %v1512_v59 = vld [vmem:[#allocation14 + $0x158] sm:$0xff] }
 0x38a   :  { %1897 = vmatprep.subr.bf16.mxu1 %v2320_v8  ;;  %v2368_v3 = vcombine.high %v1525_v0, %v1529_v1  ;;  %v2367_v5 = vcombine.low %v1525_v0, %v1529_v1  ;;  %v1471_v8 = vld [vmem:[#allocation14 + $0x10] sm:$0xff]  ;;  %v1516_v60 = vld [vmem:[#allocation14 + $0x178] sm:$0xff] }
 0x38b   :  { %v2358_v0 = vcombine.high %v1512_v59, %v1516_v60  ;;  %v1519_v1 = vld [vmem:[#allocation14 + $0x190] sm:$0xff] }
 0x38d   :  { %1898 = vmatpush1.bf16.msra.mxu1 %v2319_v9  ;;  %v1475_v9 = vld [vmem:[#allocation14 + $0x30] sm:$0xff] }
 0x38e   :  { %1899 = vmatprep.subr.bf16.mxu1 %v2328_v11  ;;  %v2315_v11 = vcombine.low %v1471_v8, %v1475_v9 }
 0x391   :  { %1900 = vmatpush1.bf16.msra.mxu1 %v2327_v12  ;;  %v2316_v12 = vcombine.high %v1471_v8, %v1475_v9  ;;  %v1527_v9 = vld [vmem:[#allocation14 + $0x1d0] sm:$0xff] }
 0x392   :  { %1901 = vmatprep.subr.bf16.mxu1 %v2336_v15  ;;  %v2318_v15 = vcombine.high %v1472_v10, %v1476_v13  ;;  %v1531_v10 = vld [vmem:[#allocation14 + $0x1f0] sm:$0xff] }
 0x395   :  { %1902 = vmatpush1.bf16.msra.mxu1 %v2335_v16  ;;  %v2302_v16 = vld [vmem:[%s3409_s13] ss:$0 sm:$0xff]  ;;  %s3047_s13 = smov [#allocation17]  }
 0x396   :  { %1903 = vmatprep.subr.bf16.mxu1 %v2344_v19  ;;  %s2171_s29 = sshll.u32 %s3047_s13, 4  ;;  %s2172_s29 = int_to_ptr.vmem [resolvable:$true] %s2171_s29 }
 0x397   :  { %s2951_s22 = scalar_lea.vmem %s2172_s29, 32  ;;  %p2956_p9 = scmp.lt.s32.totalorder %s2172_s29, %s2172_s29 }
 0x398   :  { %p2952_p8 = scmp.ne.s32.totalorder %s2172_s29, %s2951_s22  ;;  %p2957_p10 = scmp.lt.s32.totalorder %s2951_s22, %s2951_s22 }
 0x399   :  { %1904 = vmatpush1.bf16.msra.mxu1 %v2343_v20  ;;  %v1479_v20 = vld [vmem:[#allocation14 + $0x50] sm:$0xff] }
 0x39a   :  { %1905 = vmatprep.subr.bf16.mxu1 %v2352_v23  ;;  %v1480_v23 = vld [vmem:[#allocation14 + $0x58] sm:$0xff]  ;;  %v2323_v37 = vcombine.low %v1479_v20, %v1483_v22  ;;  %p2958_p11 = por %p2957_p10, %p2956_p9 }
 0x39c   :  { %p2959_p12 = pnand %p2958_p11, %p2952_p8 }
 0x39d   :  { %1906 = vmatpush1.bf16.msra.mxu1 %v2351_v24  ;;  %v1484_v24 = vld [vmem:[#allocation14 + $0x78] sm:$0xff] }
 0x39e   :  { %1907 = vmatprep.subr.bf16.mxu1 %v2360_v28  ;;  %v2325_v38 = vcombine.low %v1480_v23, %v1484_v24 }
 0x3a1   :  { %1908 = vmatpush1.bf16.msra.mxu1 %v2359_v29  ;;  %v2324_v29 = vcombine.high %v1479_v20, %v1483_v22 }
 0x3a2   :  { %1909 = vmatprep.subr.bf16.mxu1 %v2368_v3  ;;  %v1520_v3 = vld [vmem:[#allocation14 + $0x198] sm:$0xff] }
 0x3a5   :  { %1910 = vmatpush1.bf16.msra.mxu1 %v2367_v5 }
 0x3a6   :  { %1977 = vmatprep.subr.bf16.mxu1 %v2316_v12 }
 0x45b   :  { %v1348_v32 = vpop.f32.mrb[12].mxu1 }
 0x45c   :  { %v1349_v33 = vadd.f32 %v2293_v31, %v1348_v32  ;;  %v2594_v34 = vpop.f32.mrb[13].mxu1  ;;  %v2326_v31 = vcombine.high %v1480_v23, %v1484_v24  ;;  %v1487_v32 = vld [vmem:[#allocation14 + $0x90] sm:$0xff] }
 0x45d   :  { %v1351_v36 = vpop.f32.mrb[14].mxu1  ;;  %v1488_v34 = vld [vmem:[#allocation14 + $0x98] sm:$0xff] }
 0x45e   :  { %v1354_v39 = vmax.f32 %v1349_v33, 0.0  ;;  %v2595_v40 = vpop.f32.mrb[15].mxu1  ;;  %v1491_v33 = vld [vmem:[#allocation14 + $0xb0] sm:$0xff]  ;;  %v1492_v36 = vld [vmem:[#allocation14 + $0xb8] sm:$0xff] }
 0x45f   :  { %v2334_v40 = vcombine.high %v1488_v34, %v1492_v36 }
 0x460   :  { %v1355_v41 = vpack.c.bf16 %v1354_v39, %v1354_v39  ;;  %v2332_v39 = vcombine.high %v1487_v32, %v1491_v33 }
 0x462   :  { %2613 = vmatmul.mubr.bf16.vlgmr.msra.gmra.mrb[16].mxu0 %v1355_v41  ;;  %v1495_v41 = vld [vmem:[#allocation14 + $0xd0] sm:$0xff] }
 0x463   :  { %1937 = vmatpush1.bf16.msra.mxu0 %v2313_v6  ;;  %v2369_v6 = vcombine.low %v1526_v2, %v1530_v4  ;;  %1968 = vmatprep.mubr.bf16.mxu0 %v3046_v27  ;;  %v1523_v2 = vld [vmem:[#allocation14 + $0x1b0] sm:$0xff]  ;;  %v1524_v4 = vld [vmem:[#allocation14 + $0x1b8] sm:$0xff] }
 0x464   :  { %1938 = vmatprep.subr.bf16.mxu0 %v2322_v42  ;;  %v1499_v42 = vld [vmem:[#allocation14 + $0xf0] sm:$0xff]  ;;  %v2366_v8 = vcombine.high %v1520_v3, %v1524_v4  ;;  %v2363_v12 = vcombine.low %v1519_v1, %v1523_v2  ;;  %v2365_v13 = vcombine.low %v1520_v3, %v1524_v4 }
 0x465   :  { %v2340_v47 = vcombine.high %v1495_v41, %v1499_v42 }
 0x467   :  { %1939 = vmatpush1.bf16.msra.mxu0 %v2321_v45  ;;  %v2331_v45 = vcombine.low %v1487_v32, %v1491_v33 }
 0x468   :  { %1940 = vmatprep.subr.bf16.mxu0 %v2330_v46  ;;  %v2333_v46 = vcombine.low %v1488_v34, %v1492_v36 }
 0x46b   :  { %1941 = vmatpush1.bf16.msra.mxu0 %v2329_v49  ;;  %v1503_v49 = vld [vmem:[#allocation14 + $0x110] sm:$0xff] }
 0x46c   :  { %1942 = vmatprep.subr.bf16.mxu0 %v2338_v50  ;;  %v1507_v50 = vld [vmem:[#allocation14 + $0x130] sm:$0xff] }
 0x46d   :  { %v2348_v55 = vcombine.high %v1503_v49, %v1507_v50 }
 0x46f   :  { %1943 = vmatpush1.bf16.msra.mxu0 %v2337_v53  ;;  %v2339_v53 = vcombine.low %v1495_v41, %v1499_v42 }
 0x470   :  { %1944 = vmatprep.subr.bf16.mxu0 %v2346_v54  ;;  %v2341_v54 = vcombine.low %v1496_v43, %v1500_v44 }
 0x473   :  { %1945 = vmatpush1.bf16.msra.mxu0 %v2345_v57  ;;  %v1511_v57 = vld [vmem:[#allocation14 + $0x150] sm:$0xff] }
 0x474   :  { %1946 = vmatprep.subr.bf16.mxu0 %v2354_v58  ;;  %v1515_v58 = vld [vmem:[#allocation14 + $0x170] sm:$0xff] }
 0x475   :  { %v2355_v5 = vcombine.low %v1511_v57, %v1515_v58 }
 0x477   :  { %1947 = vmatpush1.bf16.msra.mxu0 %v2353_v61  ;;  %v2347_v61 = vcombine.low %v1503_v49, %v1507_v50 }
 0x478   :  { %1948 = vmatprep.subr.bf16.mxu0 %v2362_v62  ;;  %v2349_v62 = vcombine.low %v1504_v51, %v1508_v52 }
 0x47b   :  { %1949 = vmatpush1.bf16.msra.mxu0 %v2361_v63  ;;  %v2356_v63 = vcombine.high %v1511_v57, %v1515_v58 }
 0x47c   :  { %1950 = vmatprep.subr.bf16.mxu0 %v2370_v7  ;;  %v2364_v7 = vcombine.high %v1519_v1, %v1523_v2 }
 0x47f   :  { %1951 = vmatpush1.bf16.msra.mxu0 %v2369_v6  ;;  %v2357_v6 = vcombine.low %v1512_v59, %v1516_v60 }
 0x480   :  { %2018 = vmatprep.subr.bf16.mxu0 %v2318_v15 }
 0x535   :  { %v1461_v17 = vpop.f32.mrb[16].mxu0 }
 0x536   :  { %v1462_v18 = vadd.f32 %v2302_v16, %v1461_v17  ;;  %v2614_v19 = vpop.f32.mrb[17].mxu0  ;;  %v2371_v16 = vcombine.low %v1527_v9, %v1531_v10 }
 0x537   :  { %v1464_v21 = vpop.f32.mrb[18].mxu0 }
 0x538   :  { %v1467_v25 = vmax.f32 %v1462_v18, 0.0  ;;  %v2615_v26 = vpop.f32.mrb[19].mxu0 }
 0x53a   :  { %v3339_v28 = vpack.c.bf16 %v1467_v25, %v1467_v25 }
 0x53c   :  { %1928 = vmatmul.mubr.bf16.vlgmr.msra.gmra.mrb[16].mxu1 %v3339_v28  ;;  %1969 = vmatmul.mubr.bf16.vlgmr.msra.gmra.mrb[20].mxu0 %v3339_v28 }
 0x53d   :  { %1978 = vmatpush1.bf16.msra.mxu1 %v2315_v11  ;;  %2019 = vmatpush1.bf16.msra.mxu0 %v2317_v14  ;;  %v1532_v11 = vld [vmem:[#allocation14 + $0x1f8] sm:$0xff]  ;;  %v2372_v14 = vcombine.high %v1527_v9, %v1531_v10 }
 0x53e   :  { %1979 = vmatprep.subr.bf16.mxu1 %v2324_v29  ;;  %2020 = vmatprep.subr.bf16.mxu0 %v2326_v31 }
 0x53f   :  { %2009 = vmatprep.mubr.bf16.mxu1 %v3046_v27  ;;  %2050 = vmatprep.mubr.bf16.mxu0 %v3046_v27  ;;  %v1528_v27 = vld [vmem:[#allocation14 + $0x1d8] sm:$0xff] }
 0x540   :  { %v2374_v15 = vcombine.high %v1528_v27, %v1532_v11  ;;  %v2373_v17 = vcombine.low %v1528_v27, %v1532_v11 }
 0x541   :  { %1980 = vmatpush1.bf16.msra.mxu1 %v2323_v37  ;;  %2021 = vmatpush1.bf16.msra.mxu0 %v2325_v38 }
 0x542   :  { %1981 = vmatprep.subr.bf16.mxu1 %v2332_v39  ;;  %2022 = vmatprep.subr.bf16.mxu0 %v2334_v40 }
 0x545   :  { %1982 = vmatpush1.bf16.msra.mxu1 %v2331_v45  ;;  %2023 = vmatpush1.bf16.msra.mxu0 %v2333_v46 }
 0x546   :  { %1983 = vmatprep.subr.bf16.mxu1 %v2340_v47  ;;  %2024 = vmatprep.subr.bf16.mxu0 %v2342_v48 }
 0x549   :  { %1984 = vmatpush1.bf16.msra.mxu1 %v2339_v53  ;;  %2025 = vmatpush1.bf16.msra.mxu0 %v2341_v54 }
 0x54a   :  { %1985 = vmatprep.subr.bf16.mxu1 %v2348_v55  ;;  %2026 = vmatprep.subr.bf16.mxu0 %v2350_v56 }
 0x54d   :  { %1986 = vmatpush1.bf16.msra.mxu1 %v2347_v61  ;;  %2027 = vmatpush1.bf16.msra.mxu0 %v2349_v62 }
 0x54e   :  { %1987 = vmatprep.subr.bf16.mxu1 %v2356_v63  ;;  %2028 = vmatprep.subr.bf16.mxu0 %v2358_v0 }
 0x551   :  { %1988 = vmatpush1.bf16.msra.mxu1 %v2355_v5  ;;  %2029 = vmatpush1.bf16.msra.mxu0 %v2357_v6 }
 0x552   :  { %1989 = vmatprep.subr.bf16.mxu1 %v2364_v7  ;;  %2030 = vmatprep.subr.bf16.mxu0 %v2366_v8 }
 0x555   :  { %1990 = vmatpush1.bf16.msra.mxu1 %v2363_v12  ;;  %2031 = vmatpush1.bf16.msra.mxu0 %v2365_v13 }
 0x556   :  { %1991 = vmatprep.subr.bf16.mxu1 %v2372_v14  ;;  %2032 = vmatprep.subr.bf16.mxu0 %v2374_v15 }
 0x559   :  { %1992 = vmatpush1.bf16.msra.mxu1 %v2371_v16  ;;  %2033 = vmatpush1.bf16.msra.mxu0 %v2373_v17 }
 0x55c   :  { %2010 = vmatmul.mubr.bf16.vlgmr.msra.gmra.mrb[20].mxu1 %v3339_v28  ;;  %2051 = vmatmul.mubr.bf16.vlgmr.msra.gmra.mrb[24].mxu0 %v3339_v28 }
 0x55d   :  { %2962 = shalt.err (!%p2959_p12)
}
 0x55e   :  { %s2963_s3 = scalar_lea.hbm %s3413_s17, 32 }
 0x55f   :  { %p2964_p13 = scmp.ne.s32.totalorder %s3413_s17, %s2963_s3  ;;  %p2967_p0 = scmp.lt.u32.totalorder %s2963_s3, %s3413_s17 }
 0x561   :  { %p2969_p1 = pnand %p2967_p0, %p2964_p13 }
 0x563   :  { %2972 = shalt.err (!%p2969_p1)
}
 0x564   :  { %2174 = dma.vmem_to_hbm [thread:$0]  %s2172_s29, 32, %s3413_s17, [#allocation18]  }
 0x565   :  { %s3048_s24 = smov [#allocation19]  }
 0x566   :  { %s2181_s10 = sshll.u32 %s3048_s24, 4  ;;  %s2182_s10 = int_to_ptr.vmem [resolvable:$true] %s2181_s10 }
 0x567   :  { %s2973_s14 = scalar_lea.vmem %s2182_s10, 32  ;;  %p2978_p3 = scmp.lt.s32.totalorder %s2182_s10, %s2182_s10 }
 0x568   :  { %p2974_p2 = scmp.ne.s32.totalorder %s2182_s10, %s2973_s14  ;;  %p2979_p4 = scmp.lt.s32.totalorder %s2973_s14, %s2973_s14 }
 0x56a   :  { %p2980_p5 = por %p2979_p4, %p2978_p3 }
 0x56c   :  { %p2981_p6 = pnand %p2980_p5, %p2974_p2 }
 0x56e   :  { %2984 = shalt.err (!%p2981_p6)
}
 0x56f   :  { %s2985_s30 = scalar_lea.hbm %s3414_s18, 32 }
 0x570   :  { %p2986_p7 = scmp.ne.s32.totalorder %s3414_s18, %s2985_s30  ;;  %p2989_p8 = scmp.lt.u32.totalorder %s2985_s30, %s3414_s18 }
 0x572   :  { %p2991_p9 = pnand %p2989_p8, %p2986_p7 }
 0x574   :  { %2994 = shalt.err (!%p2991_p9)
}
 0x575   :  { %2184 = dma.vmem_to_hbm [thread:$0]  %s2182_s10, 32, %s3414_s18, [#allocation18]   ;;  %v1537_v18 = vsub.s32 0, %v3259_v30  ;;  %v1545_v19 = vsub.s32 2, %v3259_v30  ;;  %v1541_v21 = vsub.s32 1, %v3259_v30  ;;  %v1549_v22 = vsub.s32 3, %v3259_v30 }
 0x576   :  { %s3426_s8 = sld [smem:[#allocation30_spill]]  ;;  %v1553_v54 = vsub.s32 4, %v3259_v30  ;;  %v1561_v55 = vsub.s32 6, %v3259_v30  ;;  %v1557_v56 = vsub.s32 5, %v3259_v30  ;;  %v1565_v57 = vsub.s32 7, %v3259_v30  ;;  %s3049_s18 = smov [#allocation16]  }
 0x577   :  { %s2161_s9 = sshll.u32 %s3049_s18, 4  ;;  %s2162_s9 = int_to_ptr.vmem [resolvable:$true] %s2161_s9 }
 0x578   :  { %s2995_s11 = scalar_lea.vmem %s2162_s9, 256  ;;  %p3000_p11 = scmp.lt.s32.totalorder %s2162_s9, %s2162_s9 }
 0x579   :  { %p2996_p10 = scmp.ne.s32.totalorder %s2162_s9, %s2995_s11  ;;  %p3001_p12 = scmp.lt.s32.totalorder %s2995_s11, %s2995_s11 }
 0x57b   :  { %p3002_p13 = por %p3001_p12, %p3000_p11 }
 0x57c   :  { %v1533_v20 = vld [vmem:[%s3426_s8] sm:$0xff] }
 0x57d   :  { %v1538_v23 = vrot.slane %v1533_v20, %v1537_v18  ;;  %v1546_v24 = vrot.slane %v1533_v20, %v1545_v19  ;;  %v1542_v25 = vrot.slane %v1533_v20, %v1541_v21  ;;  %v1550_v26 = vrot.slane %v1533_v20, %v1549_v22  ;;  %p3003_p0 = pnand %p3002_p13, %p2996_p10 }
 0x57e   :  { %v1554_v60 = vrot.slane %v1533_v20, %v1553_v54  ;;  %v1562_v61 = vrot.slane %v1533_v20, %v1561_v55  ;;  %v1558_v63 = vrot.slane %v1533_v20, %v1557_v56  ;;  %v1566_v0 = vrot.slane %v1533_v20, %v1565_v57 }
 0x60f   :  { %v1929_v28 = vpop.f32.mrb[16].mxu1  ;;  %v1970_v29 = vpop.f32.mrb[20].mxu0 }
 0x610   :  { %v1930_v31 = vadd.f32 %v1929_v28, %v1538_v23  ;;  %v1971_v32 = vadd.f32 %v1970_v29, %v1546_v24  ;;  %v1931_v33 = vpop.f32.mrb[17].mxu1  ;;  %v1972_v34 = vpop.f32.mrb[21].mxu0 }
 0x611   :  { %v1932_v36 = vadd.f32 %v1931_v33, %v1542_v25  ;;  %v1973_v37 = vadd.f32 %v1972_v34, %v1550_v26  ;;  %v1933_v38 = vpop.f32.mrb[18].mxu1  ;;  %v1974_v39 = vpop.f32.mrb[22].mxu0 }
 0x612   :  { %v2375_v40 = vmul.f32 -1.442695, %v1930_v31  ;;  %v2377_v41 = vmul.f32 -1.442695, %v1971_v32  ;;  %v1934_v42 = vpop.f32.mrb[19].mxu1  ;;  %v1975_v43 = vpop.f32.mrb[23].mxu0 }
 0x613   :  { %v2376_v44 = vmul.f32 -1.442695, %v1932_v36  ;;  %v2378_v45 = vmul.f32 -1.442695, %v1973_v37 }
 0x614   :  { %2743 = vpow2.f32 %v2375_v40 }
 0x615   :  { %2745 = vpow2.f32 %v2377_v41 }
 0x616   :  { %2747 = vpow2.f32 %v2376_v44 }
 0x617   :  { %2749 = vpow2.f32 %v2378_v45 }
 0x61e   :  { %v2744_v46 = vpop.eup %2743 }
 0x61f   :  { %v2746_v47 = vpop.eup %2745  ;;  %v2083_v48 = vadd.f32 1.0, %v2744_v46 }
 0x620   :  { %v2748_v49 = vpop.eup %2747  ;;  %v2085_v50 = vadd.f32 1.0, %v2746_v47 }
 0x621   :  { %v2750_v51 = vpop.eup %2749  ;;  %2751 = vrcp.f32 %v2083_v48  ;;  %v2084_v52 = vadd.f32 1.0, %v2748_v49 }
 0x622   :  { %2753 = vrcp.f32 %v2085_v50  ;;  %v2086_v53 = vadd.f32 1.0, %v2750_v51 }
 0x623   :  { %2755 = vrcp.f32 %v2084_v52 }
 0x624   :  { %2757 = vrcp.f32 %v2086_v53 }
 0x62b   :  { %v2752_v58 = vpop.eup %2751 }
 0x62c   :  { %v2754_v59 = vpop.eup %2753 }
 0x62d   :  { %v2756_v62 = vpop.eup %2755 }
 0x62e   :  { %v2758_v1 = vpop.eup %2757  ;;  %v2115_v2 = vcombine.low %v2752_v58, %v2756_v62 }
 0x62f   :  { %v2011_v3 = vpop.f32.mrb[20].mxu1  ;;  %v2052_v4 = vpop.f32.mrb[24].mxu0  ;;  %v2116_v5 = vcombine.low %v2754_v59, %v2758_v1 }
 0x630   :  { %v2012_v6 = vadd.f32 %v2011_v3, %v1554_v60  ;;  %v2053_v7 = vadd.f32 %v2052_v4, %v1562_v61  ;;  %v2013_v8 = vpop.f32.mrb[21].mxu1  ;;  %v2054_v9 = vpop.f32.mrb[25].mxu0  ;;  %v2123_v10 = vrot.slane %v2115_v2, %v3262_v35 }
 0x631   :  { %v2014_v27 = vadd.f32 %v2013_v8, %v1558_v63  ;;  %v2055_v30 = vadd.f32 %v2054_v9, %v1566_v0  ;;  %v2015_v11 = vpop.f32.mrb[22].mxu1  ;;  %v2056_v12 = vpop.f32.mrb[26].mxu0  ;;  %v2130_v13 = vrot.slane %v2116_v5, %v3262_v35 }
 0x632   :  { %v2379_v14 = vmul.f32 -1.442695, %v2012_v6  ;;  %v2381_v15 = vmul.f32 -1.442695, %v2053_v7  ;;  %v2016_v16 = vpop.f32.mrb[23].mxu1  ;;  %v2057_v17 = vpop.f32.mrb[27].mxu0 }
 0x633   :  { %v2380_v18 = vmul.f32 -1.442695, %v2014_v27  ;;  %v2382_v19 = vmul.f32 -1.442695, %v2055_v30  ;;  %v2131_v20 = vcombine.low %v2123_v10, %v2130_v13 }
 0x634   :  { %2759 = vpow2.f32 %v2379_v14 }
 0x635   :  { %2761 = vpow2.f32 %v2381_v15  ;;  %2151 = vst [vmem:[#allocation16] sm:$0xff] %v2131_v20 }
 0x636   :  { %2763 = vpow2.f32 %v2380_v18 }
 0x637   :  { %2765 = vpow2.f32 %v2382_v19 }
 0x63e   :  { %v2760_v21 = vpop.eup %2759 }
 0x63f   :  { %v2762_v22 = vpop.eup %2761  ;;  %v2087_v23 = vadd.f32 1.0, %v2760_v21 }
 0x640   :  { %v2764_v24 = vpop.eup %2763  ;;  %v2089_v25 = vadd.f32 1.0, %v2762_v22 }
 0x641   :  { %v2766_v26 = vpop.eup %2765  ;;  %2767 = vrcp.f32 %v2087_v23  ;;  %v2088_v28 = vadd.f32 1.0, %v2764_v24 }
 0x642   :  { %2769 = vrcp.f32 %v2089_v25  ;;  %v2090_v29 = vadd.f32 1.0, %v2766_v26 }
 0x643   :  { %2771 = vrcp.f32 %v2088_v28 }
 0x644   :  { %2773 = vrcp.f32 %v2090_v29 }
 0x64b   :  { %v2768_v31 = vpop.eup %2767 }
 0x64c   :  { %v2770_v32 = vpop.eup %2769 }
 0x64d   :  { %v2772_v33 = vpop.eup %2771 }
 0x64e   :  { %v2774_v34 = vpop.eup %2773  ;;  %v2132_v36 = vcombine.low %v2768_v31, %v2772_v33 }
 0x64f   :  { %v2133_v37 = vcombine.low %v2770_v32, %v2774_v34 }
 0x650   :  { %v2140_v38 = vrot.slane %v2132_v36, %v3262_v35 }
 0x651   :  { %v2147_v39 = vrot.slane %v2133_v37, %v3262_v35 }
 0x653   :  { %v2148_v40 = vcombine.low %v2140_v38, %v2147_v39 }
 0x655   :  { %2152 = vst [vmem:[#allocation16 + $0x8] sm:$0xff] %v2148_v40 }
 0x656   :  { %3006 = shalt.err (!%p3003_p0)
}
 0x657   :  { %s3427_s29 = sld [smem:[#allocation31_spill]] }
 0x65d   :  { %s3007_s22 = scalar_lea.hbm %s3427_s29, 256 }
 0x65e   :  { %p3008_p1 = scmp.ne.s32.totalorder %s3427_s29, %s3007_s22  ;;  %p3011_p2 = scmp.lt.u32.totalorder %s3007_s22, %s3427_s29 }
 0x660   :  { %p3013_p3 = pnand %p3011_p2, %p3008_p1 }
 0x662   :  { %3016 = shalt.err (!%p3013_p3)
}
 0x663   :  { %2164 = dma.vmem_to_hbm [thread:$0]  %s2162_s9, 256, %s3427_s29, [#allocation4]  }
 0x664   :  { %3027 = dma.done.wait [#allocation4], 256  }
 0x665   :  { %3028 = vsyncadd [#allocation4], 4294967040 }
 0x666   :  { %3029 = dma.done.wait [#allocation18], 64  }
 0x667   :  { %3030 = vsyncadd [#allocation18], 4294967232 }
 0x668   :  { %2194 = vsyncpa [#allocation3], 1 }
 0x669   :  { %2195 = vsyncpa [#allocation6], 1 }
 0x66a   :  { %2196 = vsyncpa [#allocation9], 1 }
 0x66b   :  { %2197 = vsyncpa [#allocation12], 1 }
 0x66c   :  { %2198 = vsyncpa [#allocation15], 1 }
 0x66d   :  { %2199 = vsyncpa [#allocation4], 1 }
 0x66e   :  { %2200 = vsyncpa [#allocation18], 1 }

</bundles_post_ra>
